<compile_context>
chip_gen: v7x
topology: tpu7x:2x2x1
jax: 0.10.0
libtpu: 0.0.40
codegen_flags: <defaults>
</compile_context>

<pallas_src>
import jax
import jax.numpy as jnp
from jax.experimental import pallas as pl
from jax.experimental.pallas import tpu as pltpu


def _make_residual_block_kernel(H, W):
    P = H * W                                # pixels per image (lane axis)
    HALO = W + 1                             # max |dy*W + dx| for a 3x3 tap
    OFF = ((HALO + 127) // 128) * 128        # interior offset, 128-lane aligned
    pad_width = OFF + P + HALO               # scratch width

    def kernel(x_ref, w1_ref, b1_ref, w2_ref, b2_ref, out_ref, pad_ref):
        # x_ref/out_ref: (C, P)      one image, channels on sublanes, pixels on lanes
        # w*_ref:        (9, C, C)   per-tap weight matrices, k = ky*3 + kx
        # b*_ref:        (C, 1)      biases (lane-broadcast once per conv)
        # pad_ref:       (C, pad_width) f32 scratch (halo-padded flattened image)
        C = x_ref.shape[0]

        # Zero only the halo strips the shifted reads can touch; the interior is
        # fully overwritten before every conv.  Re-done each grid step so the
        # kernel is correct no matter how grid steps map to cores.
        zhalo = jnp.zeros((C, HALO), jnp.float32)
        pad_ref[:, OFF - HALO:OFF] = zhalo
        pad_ref[:, OFF + P:OFF + P + HALO] = zhalo

        # Column-validity masks: taps with dx != 0 must not pick up pixels that
        # belong to the neighbouring row of the flattened image.
        xq = jax.lax.broadcasted_iota(jnp.int32, (1, P), 1) % W
        col_ok = {-1: xq >= 1, 0: None, 1: xq <= W - 2}

        def conv3x3(activated, w_ref, b_ref):
            # activated: (C, P) f32, already ReLU'd.
            # "same" 3x3 cross-correlation = 9 shifted-view MXU matmuls.
            pad_ref[:, OFF:OFF + P] = activated          # aligned interior write
            acc = None
            k = 0
            for dy in (-1, 0, 1):
                for dx in (-1, 0, 1):
                    shift = dy * W + dx
                    view = pad_ref[:, OFF + shift:OFF + shift + P]   # (C, P)
                    if col_ok[dx] is not None:
                        view = jnp.where(col_ok[dx], view, 0.0)
                    tap = jax.lax.dot_general(
                        w_ref[k], view,
                        dimension_numbers=(((1,), (0,)), ((), ())),
                        precision=jax.lax.Precision.HIGHEST,
                        preferred_element_type=jnp.float32)          # (C_out, P)
                    acc = tap if acc is None else acc + tap
                    k += 1
            return acc + b_ref[...]                      # bias: one fused add

        # output = conv1(relu(input)); output = conv2(relu(output))
        h = conv3x3(jnp.maximum(x_ref[...].astype(jnp.float32), 0.0), w1_ref, b1_ref)
        h = conv3x3(jnp.maximum(h, 0.0), w2_ref, b2_ref)
        # return input + output  (re-read x instead of keeping it live across convs)
        out_ref[...] = (x_ref[...].astype(jnp.float32) + h).astype(out_ref.dtype)

    return kernel, pad_width


def residual_block(x_nchw, w1_oihw, b1, w2_oihw, b2):
    """PyTorch-layout entry point: x is NCHW (f32), conv weights are OIHW, biases (C,)."""
    N, C, H, W = x_nchw.shape
    P = H * W

    # Free layout change: NCHW -> (N, C, H*W) merges trailing dims only.
    x_flat = x_nchw.reshape(N, C, P)

    # Per-tap weight matrices, reshaped once outside the kernel:
    # OIHW (C_out, C_in, 3, 3) -> (9, C_out, C_in), tap index k = ky*3 + kx.
    w1_taps = jnp.transpose(w1_oihw, (2, 3, 0, 1)).reshape(9, C, C)
    w2_taps = jnp.transpose(w2_oihw, (2, 3, 0, 1)).reshape(9, C, C)
    b1_col = b1.reshape(C, 1)
    b2_col = b2.reshape(C, 1)

    kernel, pad_width = _make_residual_block_kernel(H, W)

    out_flat = pl.pallas_call(
        kernel,
        out_shape=jax.ShapeDtypeStruct((N, C, P), x_nchw.dtype),
        grid_spec=pltpu.PrefetchScalarGridSpec(
            num_scalar_prefetch=0,
            grid=(N,),                                              # one image per step
            in_specs=[
                pl.BlockSpec((None, C, P), lambda n: (n, 0, 0)),    # x image (lane-dense)
                pl.BlockSpec((9, C, C), lambda n: (0, 0, 0)),       # w1 taps (resident)
                pl.BlockSpec((C, 1), lambda n: (0, 0)),             # b1
                pl.BlockSpec((9, C, C), lambda n: (0, 0, 0)),       # w2 taps (resident)
                pl.BlockSpec((C, 1), lambda n: (0, 0)),             # b2
            ],
            out_specs=pl.BlockSpec((None, C, P), lambda n: (n, 0, 0)),
            scratch_shapes=[pltpu.VMEM((C, pad_width), jnp.float32)],
        ),
        compiler_params=pltpu.CompilerParams(
            dimension_semantics=("parallel",)),       # batch axis -> megacore on v7x
    )(x_flat, w1_taps, b1_col, w2_taps, b2_col)

    return out_flat.reshape(N, C, H, W)


def _reference(x_nchw, w1_oihw, b1, w2_oihw, b2):
    # Pure-JAX reference mirroring the PyTorch forward exactly.
    def conv(x, w, b):
        y = jax.lax.conv_general_dilated(
            x, w, window_strides=(1, 1), padding=((1, 1), (1, 1)),
            dimension_numbers=("NCHW", "OIHW", "NCHW"),
            precision=jax.lax.Precision.HIGHEST)
        return y + b[None, :, None, None]

    out = conv(jax.nn.relu(x_nchw), w1_oihw, b1)
    out = conv(jax.nn.relu(out), w2_oihw, b2)
    return x_nchw + out


if __name__ == "__main__":
    N, C, H, W = 2, 4, 16, 16   # ResidualBlock(n_channels=4)

    key = jax.random.PRNGKey(0)
    kx, kw1, kb1, kw2, kb2 = jax.random.split(key, 5)

    x = jax.random.normal(kx, (N, C, H, W), jnp.float32)

    # Deterministic init mimicking nn.Conv2d defaults: U(-1/sqrt(fan_in), +1/sqrt(fan_in))
    fan_in = C * 3 * 3
    bound = 1.0 / (fan_in ** 0.5)
    w1 = jax.random.uniform(kw1, (C, C, 3, 3), jnp.float32, -bound, bound)  # OIHW
    b1 = jax.random.uniform(kb1, (C,), jnp.float32, -bound, bound)
    w2 = jax.random.uniform(kw2, (C, C, 3, 3), jnp.float32, -bound, bound)  # OIHW
    b2 = jax.random.uniform(kb2, (C,), jnp.float32, -bound, bound)

    out = jax.block_until_ready(residual_block(x, w1, b1, w2, b2))
    ref = _reference(x, w1, b1, w2, b2)

    assert out.shape == (N, C, H, W) and out.dtype == jnp.float32
    assert jnp.allclose(out, ref, atol=2e-4, rtol=2e-4), "mismatch vs reference"

    print("KERNEL_OK")
</pallas_src>

<mosaic_0001>
module attributes {stable_mosaic.version = 11 : i64} {
  func.func @kernel(%arg0: i32, %arg1: memref<1x4x256xf32, #tpu.memory_space<vmem>>, %arg2: memref<9x4x4xf32, #tpu.memory_space<vmem>>, %arg3: memref<4x1xf32, #tpu.memory_space<vmem>>, %arg4: memref<9x4x4xf32, #tpu.memory_space<vmem>>, %arg5: memref<4x1xf32, #tpu.memory_space<vmem>>, %arg6: memref<1x4x256xf32, #tpu.memory_space<vmem>>, %arg7: memref<4x401xf32, #tpu.memory_space<vmem>>) attributes {dimension_semantics = [#tpu.dimension_semantics<parallel>], iteration_bounds = array<i64: 2>, scalar_prefetch = 0 : i64, scratch_operands = 1 : i64, tpu.core_type = #tpu.core_type<tc>, window_params = [{transform_indices = @transform_0, window_bounds = array<i64: 1, 4, 256>}, {pipeline_mode = #tpu.pipeline_mode<synchronous>, transform_indices = @transform_1, window_bounds = array<i64: 9, 4, 4>}, {pipeline_mode = #tpu.pipeline_mode<synchronous>, transform_indices = @transform_2, window_bounds = array<i64: 4, 1>}, {pipeline_mode = #tpu.pipeline_mode<synchronous>, transform_indices = @transform_3, window_bounds = array<i64: 9, 4, 4>}, {pipeline_mode = #tpu.pipeline_mode<synchronous>, transform_indices = @transform_4, window_bounds = array<i64: 4, 1>}, {transform_indices = @transform_5, window_bounds = array<i64: 1, 4, 256>}]} {
    %cst = arith.constant 0.000000e+00 : f32
    %0 = vector.broadcast %cst : f32 to vector<4x17xf32>
    %c0 = arith.constant 0 : index
    %c111 = arith.constant 111 : index
    %1 = vector.load %arg7[%c0, %c111] : memref<4x401xf32, #tpu.memory_space<vmem>>, vector<4x17xf32>
    tpu.vector_store %arg7[%c0, %c111], %0 {strides = array<i32>} : memref<4x401xf32, #tpu.memory_space<vmem>>, vector<4x17xf32>,
    %c0_0 = arith.constant 0 : index
    %c384 = arith.constant 384 : index
    %2 = vector.load %arg7[%c0_0, %c384] : memref<4x401xf32, #tpu.memory_space<vmem>>, vector<4x17xf32>
    tpu.vector_store %arg7[%c0_0, %c384], %0 {strides = array<i32>} : memref<4x401xf32, #tpu.memory_space<vmem>>, vector<4x17xf32>,
    %3 = tpu.iota {dimensions = array<i32: 1>} : vector<1x256xi32>
    %c16_i32 = arith.constant 16 : i32
    %c0_i32 = arith.constant 0 : i32
    %4 = arith.cmpi eq, %c16_i32, %c0_i32 : i32
    %c1_i32 = arith.constant 1 : i32
    %5 = arith.select %4, %c1_i32, %c16_i32 : i32
    %6 = vector.broadcast %5 : i32 to vector<1x256xi32>
    %7 = arith.remsi %3, %6 : vector<1x256xi32>
    %c0_i32_1 = arith.constant 0 : i32
    %8 = vector.broadcast %c0_i32_1 : i32 to vector<1x256xi32>
    %9 = arith.cmpi ne, %7, %8 : vector<1x256xi32>
    %c0_i32_2 = arith.constant 0 : i32
    %10 = vector.broadcast %c0_i32_2 : i32 to vector<1x256xi32>
    %11 = arith.cmpi slt, %7, %10 : vector<1x256xi32>
    %c0_i32_3 = arith.constant 0 : i32
    %12 = arith.cmpi slt, %5, %c0_i32_3 : i32
    %13 = vector.broadcast %12 : i1 to vector<1x256xi1>
    %14 = vector.broadcast %13 : vector<1x256xi1> to vector<1x256xi1>
    %15 = arith.xori %11, %14 : vector<1x256xi1>
    %16 = arith.andi %15, %9 : vector<1x256xi1>
    %17 = vector.broadcast %5 : i32 to vector<1x256xi32>
    %18 = arith.addi %7, %17 : vector<1x256xi32>
    %19 = arith.select %16, %18, %7 : vector<1x256xi1>, vector<1x256xi32>
    %c1_i32_4 = arith.constant 1 : i32
    %20 = vector.broadcast %c1_i32_4 : i32 to vector<1x256xi32>
    %21 = arith.cmpi sge, %19, %20 : vector<1x256xi32>
    %c14_i32 = arith.constant 14 : i32
    %22 = vector.broadcast %c14_i32 : i32 to vector<1x256xi32>
    %23 = arith.cmpi sle, %19, %22 : vector<1x256xi32>
    %c0_5 = arith.constant 0 : index
    %c0_6 = arith.constant 0 : index
    %c0_7 = arith.constant 0 : index
    %24 = vector.load %arg1[%c0_5, %c0_6, %c0_7] : memref<1x4x256xf32, #tpu.memory_space<vmem>>, vector<1x4x256xf32>
    %25 = vector.shape_cast %24 : vector<1x4x256xf32> to vector<4x256xf32>
    %cst_8 = arith.constant 0.000000e+00 : f32
    %26 = vector.broadcast %cst_8 : f32 to vector<4x256xf32>
    %27 = arith.maximumf %25, %26 : vector<4x256xf32>
    %c0_9 = arith.constant 0 : index
    %c128 = arith.constant 128 : index
    %28 = vector.load %arg7[%c0_9, %c128] : memref<4x401xf32, #tpu.memory_space<vmem>>, vector<4x256xf32>
    tpu.vector_store %arg7[%c0_9, %c128], %27 {strides = array<i32>} : memref<4x401xf32, #tpu.memory_space<vmem>>, vector<4x256xf32>,
    %c0_10 = arith.constant 0 : index
    %c111_11 = arith.constant 111 : index
    %29 = vector.load %arg7[%c0_10, %c111_11] : memref<4x401xf32, #tpu.memory_space<vmem>>, vector<4x256xf32>
    %cst_12 = arith.constant 0.000000e+00 : f32
    %30 = vector.shape_cast %21 : vector<1x256xi1> to vector<1x256xi1>
    %31 = vector.broadcast %30 : vector<1x256xi1> to vector<4x256xi1>
    %32 = vector.broadcast %cst_12 : f32 to vector<4x256xf32>
    %33 = arith.select %31, %29, %32 : vector<4x256xi1>, vector<4x256xf32>
    %c0_13 = arith.constant 0 : index
    %c0_14 = arith.constant 0 : index
    %c0_15 = arith.constant 0 : index
    %34 = vector.load %arg2[%c0_13, %c0_14, %c0_15] : memref<9x4x4xf32, #tpu.memory_space<vmem>>, vector<1x4x4xf32>
    %35 = vector.shape_cast %34 : vector<1x4x4xf32> to vector<4x4xf32>
    %cst_16 = arith.constant dense<0.000000e+00> : vector<4x256xf32>
    %36 = tpu.matmul %35, %33, %cst_16 {dimension_numbers = #tpu.dot_dimension_numbers<[1], [0], [0], [1], [0, 0, 1, 1], [], []>, precision = #tpu.contract_precision<fp32>} : vector<4x4xf32>, vector<4x256xf32>, vector<4x256xf32> -> vector<4x256xf32>
    %c0_17 = arith.constant 0 : index
    %c112 = arith.constant 112 : index
    %37 = vector.load %arg7[%c0_17, %c112] : memref<4x401xf32, #tpu.memory_space<vmem>>, vector<4x256xf32>
    %c1 = arith.constant 1 : index
    %c0_18 = arith.constant 0 : index
    %c0_19 = arith.constant 0 : index
    %38 = vector.load %arg2[%c1, %c0_18, %c0_19] : memref<9x4x4xf32, #tpu.memory_space<vmem>>, vector<1x4x4xf32>
    %39 = vector.shape_cast %38 : vector<1x4x4xf32> to vector<4x4xf32>
    %cst_20 = arith.constant dense<0.000000e+00> : vector<4x256xf32>
    %40 = tpu.matmul %39, %37, %cst_20 {dimension_numbers = #tpu.dot_dimension_numbers<[1], [0], [0], [1], [0, 0, 1, 1], [], []>, precision = #tpu.contract_precision<fp32>} : vector<4x4xf32>, vector<4x256xf32>, vector<4x256xf32> -> vector<4x256xf32>
    %41 = arith.addf %36, %40 : vector<4x256xf32>
    %c0_21 = arith.constant 0 : index
    %c113 = arith.constant 113 : index
    %42 = vector.load %arg7[%c0_21, %c113] : memref<4x401xf32, #tpu.memory_space<vmem>>, vector<4x256xf32>
    %cst_22 = arith.constant 0.000000e+00 : f32
    %43 = vector.shape_cast %23 : vector<1x256xi1> to vector<1x256xi1>
    %44 = vector.broadcast %43 : vector<1x256xi1> to vector<4x256xi1>
    %45 = vector.broadcast %cst_22 : f32 to vector<4x256xf32>
    %46 = arith.select %44, %42, %45 : vector<4x256xi1>, vector<4x256xf32>
    %c2 = arith.constant 2 : index
    %c0_23 = arith.constant 0 : index
    %c0_24 = arith.constant 0 : index
    %47 = vector.load %arg2[%c2, %c0_23, %c0_24] : memref<9x4x4xf32, #tpu.memory_space<vmem>>, vector<1x4x4xf32>
    %48 = vector.shape_cast %47 : vector<1x4x4xf32> to vector<4x4xf32>
    %cst_25 = arith.constant dense<0.000000e+00> : vector<4x256xf32>
    %49 = tpu.matmul %48, %46, %cst_25 {dimension_numbers = #tpu.dot_dimension_numbers<[1], [0], [0], [1], [0, 0, 1, 1], [], []>, precision = #tpu.contract_precision<fp32>} : vector<4x4xf32>, vector<4x256xf32>, vector<4x256xf32> -> vector<4x256xf32>
    %50 = arith.addf %41, %49 : vector<4x256xf32>
    %c0_26 = arith.constant 0 : index
    %c127 = arith.constant 127 : index
    %51 = vector.load %arg7[%c0_26, %c127] : memref<4x401xf32, #tpu.memory_space<vmem>>, vector<4x256xf32>
    %cst_27 = arith.constant 0.000000e+00 : f32
    %52 = vector.shape_cast %21 : vector<1x256xi1> to vector<1x256xi1>
    %53 = vector.broadcast %52 : vector<1x256xi1> to vector<4x256xi1>
    %54 = vector.broadcast %cst_27 : f32 to vector<4x256xf32>
    %55 = arith.select %53, %51, %54 : vector<4x256xi1>, vector<4x256xf32>
    %c3 = arith.constant 3 : index
    %c0_28 = arith.constant 0 : index
    %c0_29 = arith.constant 0 : index
    %56 = vector.load %arg2[%c3, %c0_28, %c0_29] : memref<9x4x4xf32, #tpu.memory_space<vmem>>, vector<1x4x4xf32>
    %57 = vector.shape_cast %56 : vector<1x4x4xf32> to vector<4x4xf32>
    %cst_30 = arith.constant dense<0.000000e+00> : vector<4x256xf32>
    %58 = tpu.matmul %57, %55, %cst_30 {dimension_numbers = #tpu.dot_dimension_numbers<[1], [0], [0], [1], [0, 0, 1, 1], [], []>, precision = #tpu.contract_precision<fp32>} : vector<4x4xf32>, vector<4x256xf32>, vector<4x256xf32> -> vector<4x256xf32>
    %59 = arith.addf %50, %58 : vector<4x256xf32>
    %c0_31 = arith.constant 0 : index
    %c128_32 = arith.constant 128 : index
    %60 = vector.load %arg7[%c0_31, %c128_32] : memref<4x401xf32, #tpu.memory_space<vmem>>, vector<4x256xf32>
    %c4 = arith.constant 4 : index
    %c0_33 = arith.constant 0 : index
    %c0_34 = arith.constant 0 : index
    %61 = vector.load %arg2[%c4, %c0_33, %c0_34] : memref<9x4x4xf32, #tpu.memory_space<vmem>>, vector<1x4x4xf32>
    %62 = vector.shape_cast %61 : vector<1x4x4xf32> to vector<4x4xf32>
    %cst_35 = arith.constant dense<0.000000e+00> : vector<4x256xf32>
    %63 = tpu.matmul %62, %60, %cst_35 {dimension_numbers = #tpu.dot_dimension_numbers<[1], [0], [0], [1], [0, 0, 1, 1], [], []>, precision = #tpu.contract_precision<fp32>} : vector<4x4xf32>, vector<4x256xf32>, vector<4x256xf32> -> vector<4x256xf32>
    %64 = arith.addf %59, %63 : vector<4x256xf32>
    %c0_36 = arith.constant 0 : index
    %c129 = arith.constant 129 : index
    %65 = vector.load %arg7[%c0_36, %c129] : memref<4x401xf32, #tpu.memory_space<vmem>>, vector<4x256xf32>
    %cst_37 = arith.constant 0.000000e+00 : f32
    %66 = vector.shape_cast %23 : vector<1x256xi1> to vector<1x256xi1>
    %67 = vector.broadcast %66 : vector<1x256xi1> to vector<4x256xi1>
    %68 = vector.broadcast %cst_37 : f32 to vector<4x256xf32>
    %69 = arith.select %67, %65, %68 : vector<4x256xi1>, vector<4x256xf32>
    %c5 = arith.constant 5 : index
    %c0_38 = arith.constant 0 : index
    %c0_39 = arith.constant 0 : index
    %70 = vector.load %arg2[%c5, %c0_38, %c0_39] : memref<9x4x4xf32, #tpu.memory_space<vmem>>, vector<1x4x4xf32>
    %71 = vector.shape_cast %70 : vector<1x4x4xf32> to vector<4x4xf32>
    %cst_40 = arith.constant dense<0.000000e+00> : vector<4x256xf32>
    %72 = tpu.matmul %71, %69, %cst_40 {dimension_numbers = #tpu.dot_dimension_numbers<[1], [0], [0], [1], [0, 0, 1, 1], [], []>, precision = #tpu.contract_precision<fp32>} : vector<4x4xf32>, vector<4x256xf32>, vector<4x256xf32> -> vector<4x256xf32>
    %73 = arith.addf %64, %72 : vector<4x256xf32>
    %c0_41 = arith.constant 0 : index
    %c143 = arith.constant 143 : index
    %74 = vector.load %arg7[%c0_41, %c143] : memref<4x401xf32, #tpu.memory_space<vmem>>, vector<4x256xf32>
    %cst_42 = arith.constant 0.000000e+00 : f32
    %75 = vector.shape_cast %21 : vector<1x256xi1> to vector<1x256xi1>
    %76 = vector.broadcast %75 : vector<1x256xi1> to vector<4x256xi1>
    %77 = vector.broadcast %cst_42 : f32 to vector<4x256xf32>
    %78 = arith.select %76, %74, %77 : vector<4x256xi1>, vector<4x256xf32>
    %c6 = arith.constant 6 : index
    %c0_43 = arith.constant 0 : index
    %c0_44 = arith.constant 0 : index
    %79 = vector.load %arg2[%c6, %c0_43, %c0_44] : memref<9x4x4xf32, #tpu.memory_space<vmem>>, vector<1x4x4xf32>
    %80 = vector.shape_cast %79 : vector<1x4x4xf32> to vector<4x4xf32>
    %cst_45 = arith.constant dense<0.000000e+00> : vector<4x256xf32>
    %81 = tpu.matmul %80, %78, %cst_45 {dimension_numbers = #tpu.dot_dimension_numbers<[1], [0], [0], [1], [0, 0, 1, 1], [], []>, precision = #tpu.contract_precision<fp32>} : vector<4x4xf32>, vector<4x256xf32>, vector<4x256xf32> -> vector<4x256xf32>
    %82 = arith.addf %73, %81 : vector<4x256xf32>
    %c0_46 = arith.constant 0 : index
    %c144 = arith.constant 144 : index
    %83 = vector.load %arg7[%c0_46, %c144] : memref<4x401xf32, #tpu.memory_space<vmem>>, vector<4x256xf32>
    %c7 = arith.constant 7 : index
    %c0_47 = arith.constant 0 : index
    %c0_48 = arith.constant 0 : index
    %84 = vector.load %arg2[%c7, %c0_47, %c0_48] : memref<9x4x4xf32, #tpu.memory_space<vmem>>, vector<1x4x4xf32>
    %85 = vector.shape_cast %84 : vector<1x4x4xf32> to vector<4x4xf32>
    %cst_49 = arith.constant dense<0.000000e+00> : vector<4x256xf32>
    %86 = tpu.matmul %85, %83, %cst_49 {dimension_numbers = #tpu.dot_dimension_numbers<[1], [0], [0], [1], [0, 0, 1, 1], [], []>, precision = #tpu.contract_precision<fp32>} : vector<4x4xf32>, vector<4x256xf32>, vector<4x256xf32> -> vector<4x256xf32>
    %87 = arith.addf %82, %86 : vector<4x256xf32>
    %c0_50 = arith.constant 0 : index
    %c145 = arith.constant 145 : index
    %88 = vector.load %arg7[%c0_50, %c145] : memref<4x401xf32, #tpu.memory_space<vmem>>, vector<4x256xf32>
    %cst_51 = arith.constant 0.000000e+00 : f32
    %89 = vector.shape_cast %23 : vector<1x256xi1> to vector<1x256xi1>
    %90 = vector.broadcast %89 : vector<1x256xi1> to vector<4x256xi1>
    %91 = vector.broadcast %cst_51 : f32 to vector<4x256xf32>
    %92 = arith.select %90, %88, %91 : vector<4x256xi1>, vector<4x256xf32>
    %c8 = arith.constant 8 : index
    %c0_52 = arith.constant 0 : index
    %c0_53 = arith.constant 0 : index
    %93 = vector.load %arg2[%c8, %c0_52, %c0_53] : memref<9x4x4xf32, #tpu.memory_space<vmem>>, vector<1x4x4xf32>
    %94 = vector.shape_cast %93 : vector<1x4x4xf32> to vector<4x4xf32>
    %cst_54 = arith.constant dense<0.000000e+00> : vector<4x256xf32>
    %95 = tpu.matmul %94, %92, %cst_54 {dimension_numbers = #tpu.dot_dimension_numbers<[1], [0], [0], [1], [0, 0, 1, 1], [], []>, precision = #tpu.contract_precision<fp32>} : vector<4x4xf32>, vector<4x256xf32>, vector<4x256xf32> -> vector<4x256xf32>
    %96 = arith.addf %87, %95 : vector<4x256xf32>
    %c0_55 = arith.constant 0 : index
    %c0_56 = arith.constant 0 : index
    %97 = vector.load %arg3[%c0_55, %c0_56] : memref<4x1xf32, #tpu.memory_space<vmem>>, vector<4x1xf32>
    %98 = vector.broadcast %97 : vector<4x1xf32> to vector<4x256xf32>
    %99 = arith.addf %96, %98 : vector<4x256xf32>
    %cst_57 = arith.constant 0.000000e+00 : f32
    %100 = vector.broadcast %cst_57 : f32 to vector<4x256xf32>
    %101 = arith.maximumf %99, %100 : vector<4x256xf32>
    %c0_58 = arith.constant 0 : index
    %c128_59 = arith.constant 128 : index
    %102 = vector.load %arg7[%c0_58, %c128_59] : memref<4x401xf32, #tpu.memory_space<vmem>>, vector<4x256xf32>
    tpu.vector_store %arg7[%c0_58, %c128_59], %101 {strides = array<i32>} : memref<4x401xf32, #tpu.memory_space<vmem>>, vector<4x256xf32>,
    %c0_60 = arith.constant 0 : index
    %c111_61 = arith.constant 111 : index
    %103 = vector.load %arg7[%c0_60, %c111_61] : memref<4x401xf32, #tpu.memory_space<vmem>>, vector<4x256xf32>
    %cst_62 = arith.constant 0.000000e+00 : f32
    %104 = vector.shape_cast %21 : vector<1x256xi1> to vector<1x256xi1>
    %105 = vector.broadcast %104 : vector<1x256xi1> to vector<4x256xi1>
    %106 = vector.broadcast %cst_62 : f32 to vector<4x256xf32>
    %107 = arith.select %105, %103, %106 : vector<4x256xi1>, vector<4x256xf32>
    %c0_63 = arith.constant 0 : index
    %c0_64 = arith.constant 0 : index
    %c0_65 = arith.constant 0 : index
    %108 = vector.load %arg4[%c0_63, %c0_64, %c0_65] : memref<9x4x4xf32, #tpu.memory_space<vmem>>, vector<1x4x4xf32>
    %109 = vector.shape_cast %108 : vector<1x4x4xf32> to vector<4x4xf32>
    %cst_66 = arith.constant dense<0.000000e+00> : vector<4x256xf32>
    %110 = tpu.matmul %109, %107, %cst_66 {dimension_numbers = #tpu.dot_dimension_numbers<[1], [0], [0], [1], [0, 0, 1, 1], [], []>, precision = #tpu.contract_precision<fp32>} : vector<4x4xf32>, vector<4x256xf32>, vector<4x256xf32> -> vector<4x256xf32>
    %c0_67 = arith.constant 0 : index
    %c112_68 = arith.constant 112 : index
    %111 = vector.load %arg7[%c0_67, %c112_68] : memref<4x401xf32, #tpu.memory_space<vmem>>, vector<4x256xf32>
    %c1_69 = arith.constant 1 : index
    %c0_70 = arith.constant 0 : index
    %c0_71 = arith.constant 0 : index
    %112 = vector.load %arg4[%c1_69, %c0_70, %c0_71] : memref<9x4x4xf32, #tpu.memory_space<vmem>>, vector<1x4x4xf32>
    %113 = vector.shape_cast %112 : vector<1x4x4xf32> to vector<4x4xf32>
    %cst_72 = arith.constant dense<0.000000e+00> : vector<4x256xf32>
    %114 = tpu.matmul %113, %111, %cst_72 {dimension_numbers = #tpu.dot_dimension_numbers<[1], [0], [0], [1], [0, 0, 1, 1], [], []>, precision = #tpu.contract_precision<fp32>} : vector<4x4xf32>, vector<4x256xf32>, vector<4x256xf32> -> vector<4x256xf32>
    %115 = arith.addf %110, %114 : vector<4x256xf32>
    %c0_73 = arith.constant 0 : index
    %c113_74 = arith.constant 113 : index
    %116 = vector.load %arg7[%c0_73, %c113_74] : memref<4x401xf32, #tpu.memory_space<vmem>>, vector<4x256xf32>
    %cst_75 = arith.constant 0.000000e+00 : f32
    %117 = vector.shape_cast %23 : vector<1x256xi1> to vector<1x256xi1>
    %118 = vector.broadcast %117 : vector<1x256xi1> to vector<4x256xi1>
    %119 = vector.broadcast %cst_75 : f32 to vector<4x256xf32>
    %120 = arith.select %118, %116, %119 : vector<4x256xi1>, vector<4x256xf32>
    %c2_76 = arith.constant 2 : index
    %c0_77 = arith.constant 0 : index
    %c0_78 = arith.constant 0 : index
    %121 = vector.load %arg4[%c2_76, %c0_77, %c0_78] : memref<9x4x4xf32, #tpu.memory_space<vmem>>, vector<1x4x4xf32>
    %122 = vector.shape_cast %121 : vector<1x4x4xf32> to vector<4x4xf32>
    %cst_79 = arith.constant dense<0.000000e+00> : vector<4x256xf32>
    %123 = tpu.matmul %122, %120, %cst_79 {dimension_numbers = #tpu.dot_dimension_numbers<[1], [0], [0], [1], [0, 0, 1, 1], [], []>, precision = #tpu.contract_precision<fp32>} : vector<4x4xf32>, vector<4x256xf32>, vector<4x256xf32> -> vector<4x256xf32>
    %124 = arith.addf %115, %123 : vector<4x256xf32>
    %c0_80 = arith.constant 0 : index
    %c127_81 = arith.constant 127 : index
    %125 = vector.load %arg7[%c0_80, %c127_81] : memref<4x401xf32, #tpu.memory_space<vmem>>, vector<4x256xf32>
    %cst_82 = arith.constant 0.000000e+00 : f32
    %126 = vector.shape_cast %21 : vector<1x256xi1> to vector<1x256xi1>
    %127 = vector.broadcast %126 : vector<1x256xi1> to vector<4x256xi1>
    %128 = vector.broadcast %cst_82 : f32 to vector<4x256xf32>
    %129 = arith.select %127, %125, %128 : vector<4x256xi1>, vector<4x256xf32>
    %c3_83 = arith.constant 3 : index
    %c0_84 = arith.constant 0 : index
    %c0_85 = arith.constant 0 : index
    %130 = vector.load %arg4[%c3_83, %c0_84, %c0_85] : memref<9x4x4xf32, #tpu.memory_space<vmem>>, vector<1x4x4xf32>
    %131 = vector.shape_cast %130 : vector<1x4x4xf32> to vector<4x4xf32>
    %cst_86 = arith.constant dense<0.000000e+00> : vector<4x256xf32>
    %132 = tpu.matmul %131, %129, %cst_86 {dimension_numbers = #tpu.dot_dimension_numbers<[1], [0], [0], [1], [0, 0, 1, 1], [], []>, precision = #tpu.contract_precision<fp32>} : vector<4x4xf32>, vector<4x256xf32>, vector<4x256xf32> -> vector<4x256xf32>
    %133 = arith.addf %124, %132 : vector<4x256xf32>
    %c0_87 = arith.constant 0 : index
    %c128_88 = arith.constant 128 : index
    %134 = vector.load %arg7[%c0_87, %c128_88] : memref<4x401xf32, #tpu.memory_space<vmem>>, vector<4x256xf32>
    %c4_89 = arith.constant 4 : index
    %c0_90 = arith.constant 0 : index
    %c0_91 = arith.constant 0 : index
    %135 = vector.load %arg4[%c4_89, %c0_90, %c0_91] : memref<9x4x4xf32, #tpu.memory_space<vmem>>, vector<1x4x4xf32>
    %136 = vector.shape_cast %135 : vector<1x4x4xf32> to vector<4x4xf32>
    %cst_92 = arith.constant dense<0.000000e+00> : vector<4x256xf32>
    %137 = tpu.matmul %136, %134, %cst_92 {dimension_numbers = #tpu.dot_dimension_numbers<[1], [0], [0], [1], [0, 0, 1, 1], [], []>, precision = #tpu.contract_precision<fp32>} : vector<4x4xf32>, vector<4x256xf32>, vector<4x256xf32> -> vector<4x256xf32>
    %138 = arith.addf %133, %137 : vector<4x256xf32>
    %c0_93 = arith.constant 0 : index
    %c129_94 = arith.constant 129 : index
    %139 = vector.load %arg7[%c0_93, %c129_94] : memref<4x401xf32, #tpu.memory_space<vmem>>, vector<4x256xf32>
    %cst_95 = arith.constant 0.000000e+00 : f32
    %140 = vector.shape_cast %23 : vector<1x256xi1> to vector<1x256xi1>
    %141 = vector.broadcast %140 : vector<1x256xi1> to vector<4x256xi1>
    %142 = vector.broadcast %cst_95 : f32 to vector<4x256xf32>
    %143 = arith.select %141, %139, %142 : vector<4x256xi1>, vector<4x256xf32>
    %c5_96 = arith.constant 5 : index
    %c0_97 = arith.constant 0 : index
    %c0_98 = arith.constant 0 : index
    %144 = vector.load %arg4[%c5_96, %c0_97, %c0_98] : memref<9x4x4xf32, #tpu.memory_space<vmem>>, vector<1x4x4xf32>
    %145 = vector.shape_cast %144 : vector<1x4x4xf32> to vector<4x4xf32>
    %cst_99 = arith.constant dense<0.000000e+00> : vector<4x256xf32>
    %146 = tpu.matmul %145, %143, %cst_99 {dimension_numbers = #tpu.dot_dimension_numbers<[1], [0], [0], [1], [0, 0, 1, 1], [], []>, precision = #tpu.contract_precision<fp32>} : vector<4x4xf32>, vector<4x256xf32>, vector<4x256xf32> -> vector<4x256xf32>
    %147 = arith.addf %138, %146 : vector<4x256xf32>
    %c0_100 = arith.constant 0 : index
    %c143_101 = arith.constant 143 : index
    %148 = vector.load %arg7[%c0_100, %c143_101] : memref<4x401xf32, #tpu.memory_space<vmem>>, vector<4x256xf32>
    %cst_102 = arith.constant 0.000000e+00 : f32
    %149 = vector.shape_cast %21 : vector<1x256xi1> to vector<1x256xi1>
    %150 = vector.broadcast %149 : vector<1x256xi1> to vector<4x256xi1>
    %151 = vector.broadcast %cst_102 : f32 to vector<4x256xf32>
    %152 = arith.select %150, %148, %151 : vector<4x256xi1>, vector<4x256xf32>
    %c6_103 = arith.constant 6 : index
    %c0_104 = arith.constant 0 : index
    %c0_105 = arith.constant 0 : index
    %153 = vector.load %arg4[%c6_103, %c0_104, %c0_105] : memref<9x4x4xf32, #tpu.memory_space<vmem>>, vector<1x4x4xf32>
    %154 = vector.shape_cast %153 : vector<1x4x4xf32> to vector<4x4xf32>
    %cst_106 = arith.constant dense<0.000000e+00> : vector<4x256xf32>
    %155 = tpu.matmul %154, %152, %cst_106 {dimension_numbers = #tpu.dot_dimension_numbers<[1], [0], [0], [1], [0, 0, 1, 1], [], []>, precision = #tpu.contract_precision<fp32>} : vector<4x4xf32>, vector<4x256xf32>, vector<4x256xf32> -> vector<4x256xf32>
    %156 = arith.addf %147, %155 : vector<4x256xf32>
    %c0_107 = arith.constant 0 : index
    %c144_108 = arith.constant 144 : index
    %157 = vector.load %arg7[%c0_107, %c144_108] : memref<4x401xf32, #tpu.memory_space<vmem>>, vector<4x256xf32>
    %c7_109 = arith.constant 7 : index
    %c0_110 = arith.constant 0 : index
    %c0_111 = arith.constant 0 : index
    %158 = vector.load %arg4[%c7_109, %c0_110, %c0_111] : memref<9x4x4xf32, #tpu.memory_space<vmem>>, vector<1x4x4xf32>
    %159 = vector.shape_cast %158 : vector<1x4x4xf32> to vector<4x4xf32>
    %cst_112 = arith.constant dense<0.000000e+00> : vector<4x256xf32>
    %160 = tpu.matmul %159, %157, %cst_112 {dimension_numbers = #tpu.dot_dimension_numbers<[1], [0], [0], [1], [0, 0, 1, 1], [], []>, precision = #tpu.contract_precision<fp32>} : vector<4x4xf32>, vector<4x256xf32>, vector<4x256xf32> -> vector<4x256xf32>
    %161 = arith.addf %156, %160 : vector<4x256xf32>
    %c0_113 = arith.constant 0 : index
    %c145_114 = arith.constant 145 : index
    %162 = vector.load %arg7[%c0_113, %c145_114] : memref<4x401xf32, #tpu.memory_space<vmem>>, vector<4x256xf32>
    %cst_115 = arith.constant 0.000000e+00 : f32
    %163 = vector.shape_cast %23 : vector<1x256xi1> to vector<1x256xi1>
    %164 = vector.broadcast %163 : vector<1x256xi1> to vector<4x256xi1>
    %165 = vector.broadcast %cst_115 : f32 to vector<4x256xf32>
    %166 = arith.select %164, %162, %165 : vector<4x256xi1>, vector<4x256xf32>
    %c8_116 = arith.constant 8 : index
    %c0_117 = arith.constant 0 : index
    %c0_118 = arith.constant 0 : index
    %167 = vector.load %arg4[%c8_116, %c0_117, %c0_118] : memref<9x4x4xf32, #tpu.memory_space<vmem>>, vector<1x4x4xf32>
    %168 = vector.shape_cast %167 : vector<1x4x4xf32> to vector<4x4xf32>
    %cst_119 = arith.constant dense<0.000000e+00> : vector<4x256xf32>
    %169 = tpu.matmul %168, %166, %cst_119 {dimension_numbers = #tpu.dot_dimension_numbers<[1], [0], [0], [1], [0, 0, 1, 1], [], []>, precision = #tpu.contract_precision<fp32>} : vector<4x4xf32>, vector<4x256xf32>, vector<4x256xf32> -> vector<4x256xf32>
    %170 = arith.addf %161, %169 : vector<4x256xf32>
    %c0_120 = arith.constant 0 : index
    %c0_121 = arith.constant 0 : index
    %171 = vector.load %arg5[%c0_120, %c0_121] : memref<4x1xf32, #tpu.memory_space<vmem>>, vector<4x1xf32>
    %172 = vector.broadcast %171 : vector<4x1xf32> to vector<4x256xf32>
    %173 = arith.addf %170, %172 : vector<4x256xf32>
    %c0_122 = arith.constant 0 : index
    %c0_123 = arith.constant 0 : index
    %c0_124 = arith.constant 0 : index
    %174 = vector.load %arg1[%c0_122, %c0_123, %c0_124] : memref<1x4x256xf32, #tpu.memory_space<vmem>>, vector<1x4x256xf32>
    %175 = vector.shape_cast %174 : vector<1x4x256xf32> to vector<4x256xf32>
    %176 = arith.addf %175, %173 : vector<4x256xf32>
    %c0_125 = arith.constant 0 : index
    %c0_126 = arith.constant 0 : index
    %c0_127 = arith.constant 0 : index
    %177 = vector.load %arg6[%c0_125, %c0_126, %c0_127] : memref<1x4x256xf32, #tpu.memory_space<vmem>>, vector<1x4x256xf32>
    %178 = vector.shape_cast %177 : vector<1x4x256xf32> to vector<4x256xf32>
    %179 = vector.shape_cast %176 : vector<4x256xf32> to vector<1x4x256xf32>
    tpu.vector_store %arg6[%c0_125, %c0_126, %c0_127], %179 {strides = array<i32>} : memref<1x4x256xf32, #tpu.memory_space<vmem>>, vector<1x4x256xf32>,
    return
  }
  func.func @transform_0(%arg0: i32) -> (i32, i32, i32) {
    %c0_i32 = arith.constant 0 : i32
    %c0_i32_0 = arith.constant 0 : i32
    %c0_i32_1 = arith.constant 0 : i32
    return %arg0, %c0_i32, %c0_i32_0 : i32, i32, i32
  }
  func.func @transform_1(%arg0: i32) -> (i32, i32, i32) {
    %c0_i32 = arith.constant 0 : i32
    %c0_i32_0 = arith.constant 0 : i32
    %c0_i32_1 = arith.constant 0 : i32
    %c0_i32_2 = arith.constant 0 : i32
    return %c0_i32, %c0_i32_0, %c0_i32_1 : i32, i32, i32
  }
  func.func @transform_2(%arg0: i32) -> (i32, i32) {
    %c0_i32 = arith.constant 0 : i32
    %c0_i32_0 = arith.constant 0 : i32
    %c0_i32_1 = arith.constant 0 : i32
    return %c0_i32, %c0_i32_0 : i32, i32
  }
  func.func @transform_3(%arg0: i32) -> (i32, i32, i32) {
    %c0_i32 = arith.constant 0 : i32
    %c0_i32_0 = arith.constant 0 : i32
    %c0_i32_1 = arith.constant 0 : i32
    %c0_i32_2 = arith.constant 0 : i32
    return %c0_i32, %c0_i32_0, %c0_i32_1 : i32, i32, i32
  }
  func.func @transform_4(%arg0: i32) -> (i32, i32) {
    %c0_i32 = arith.constant 0 : i32
    %c0_i32_0 = arith.constant 0 : i32
    %c0_i32_1 = arith.constant 0 : i32
    return %c0_i32, %c0_i32_0 : i32, i32
  }
  func.func @transform_5(%arg0: i32) -> (i32, i32, i32) {
    %c0_i32 = arith.constant 0 : i32
    %c0_i32_0 = arith.constant 0 : i32
    %c0_i32_1 = arith.constant 0 : i32
    return %arg0, %c0_i32, %c0_i32_0 : i32, i32, i32
  }
}

</mosaic_0001>

<bundles_post_ra>
// kernel: tpu_custom_call.1
= control target key start
LH: loop header
LB: loop body
LE: loop exit
PB: predicated region body
PF: predicated region fallthrough
CT: control target
= control target key end

     0   :  { %10 = vsyncpa [#allocation4], 0  ;;  %s10208_s0 = inlined_call_operand.vmem [shape: f32[2,4,256], index: 0, kind: input, shape index: {}]   ;;  %s10209_s1 = inlined_call_operand.vmem [shape: f32[9,4,4], index: 1, kind: input, shape index: {}]   ;;  %s10210_s2 = inlined_call_operand.vmem [shape: f32[4,1], index: 2, kind: input, shape index: {}]   ;;  %s10211_s3 = inlined_call_operand.vmem [shape: f32[9,4,4], index: 3, kind: input, shape index: {}]   ;;  %s10212_s4 = inlined_call_operand.vmem [shape: f32[4,1], index: 4, kind: input, shape index: {}]   ;;  %s10213_s5 = inlined_call_operand.hbm [shape: f32[2,4,256], index: 5, kind: output, shape index: {}]  }
   0x1   :  { %12 = vsyncpa [#allocation4 + $0x1], 0  ;;  %s9617_s18 = smov 0   ;;  %s9619_s19 = smov 0  }
   0x2   :  { %s9621_s20 = smov 0   ;;  %s9623_s21 = smov 0  }
   0x3 LB: > { %s9638_s22 = sadd.s32 4294967295, %s9574_s21   ;;  %s9217_s23 = sadd.s32 4294967294, %s9574_s21   ;;  %s9574_s21 = sphi %s9623_s21, %s10227_s21   ;;  %s9570_s20 = sphi %s9621_s20, %s10226_s20   ;;  %s9566_s19 = sphi %s9619_s19, %s10225_s19   ;;  %s9562_s18 = sphi %s9617_s18, %s10224_s18  }
   0x4   : > { %s9642_s24 = sadd.s32 1, %s9574_s21   ;;  %s135_s25 = sadd.s32 1, %s9570_s20 }
   0x5   : > { %s132_s26 = ssub.s32 %s9574_s21, %s9642_s24  ;;  %p145_p0 = scmp.ne.s32.totalorder %s9570_s20, %s9566_s19 }
   0x6   : > { %p133_p1 = scmp.eq.s32.totalorder %s132_s26, 0  ;;  %p146_p2 = scmp.eq.s32.totalorder %s9638_s22, 1 }
   0x7   : > { %p151_p3 = scmp.ne.s32.totalorder %s9566_s19, %s9562_s18  ;;  %p152_p4 = scmp.eq.s32.totalorder %s9217_s23, 1 }
   0x8   : > { %s9653_s27 = scalar_select %p133_p1, %s9570_s20, %s135_s25  }
   0x9   : > { %p9655_p5 = por %p146_p2, %p145_p0  ;;  %p9659_p6 = por %p152_p4, %p151_p3 }
   0xa   : > { %p9220_p7 = scmp.ge.s32.totalorder %s9574_s21, 1  ;;  %p190_p8 = scmp.lt.s32.totalorder %s9574_s21, 3 }
   0xc   : > { %p191_p9 = pnand %p9220_p7, %p190_p8 }
   0xd   : > { %p218_p10 = scmp.lt.s32.totalorder (!%p191_p9), %s9638_s22, 1  ;;  %vm223_vm0 = vcmask (!%p191_p9), 1044344   ;;  %v9576_v0 = vmov (!%p191_p9), 0.0   ;;  %s9577_s10 = smov (!%p191_p9), 16   ;;  %v9224_v8 = vld [vmem:[%s10209_s1 + $0x4] sm:$0xf] (!%p191_p9)  ;;  %v227_v28 = vlaneseq (!%p191_p9) }
   0xe   : > { %194 = sbr.rel (%p191_p9) target bundleno = 1598 (0x63e), region = 40  ;;  %224 = vst.msk [vmem:[#allocation2] sm:$0xf] (!%p191_p9), %vm223_vm0, %v9576_v0  ;;  %370 = vmatprep.mubr.f32.mxu0 (!%p191_p9), %v9576_v0  ;;  %4812 = vmatprep.mubr.f32.mxu1 (!%p191_p9), %v9576_v0  ;;  %s9578_s11 = smov (!%p191_p9), 17   ;;  %vm295_vm1 = vcmask (!%p191_p9), 31744   ;;  %vm225_vm2 = vcmask (!%p191_p9), 134144  }
   0xf   : > { %s9579_s12 = smov (!%p191_p9), 15   ;;  %s9580_s13 = smov (!%p191_p9), 1   ;;  %226 = vst.msk [vmem:[#allocation2 + $0xc] sm:$0xf] (!%p191_p9), %vm225_vm2, %v9576_v0  ;;  %v297_v9 = vsel (!%p191_p9), %vm295_vm1, %v9224_v8, 0  ;;  %vm292_vm3 = vcmask (!%p191_p9), 130048  }
  0x10   : > { %v9700_v11 = vand.u32 (!%p191_p9), 4294901760, %v297_v9  ;;  %s9581_s16 = smov (!%p191_p9), 127   ;;  %vm299_vm4 = vcmask (!%p191_p9), 1043456   ;;  %v9717_v32 = vand.u32 (!%p191_p9), 127, %v227_v28  ;;  %vm276_vm5 = vcmask (!%p191_p9), 138240   ;;  %s9582_s25 = smov (!%p191_p9), 113  }
  0x11   : > { %v283_v49 = vld [vmem:[%s10209_s1] sm:$0xf] (!%p191_p9)  ;;  %vm1258_vm8 = vcmask (!%p191_p9), 121856   ;;  %vm1754_vm11 = vcmask (!%p191_p9), 7168   ;;  %s9584_s14 = smov (!%p191_p9), 111   ;;  %vm2729_vm12 = vcmask (!%p191_p9), 1039360  }
  0x12   : > { %v372_v13 = vsub.f32 (!%p191_p9), %v297_v9, %v9700_v11  ;;  %v9720_v36 = vadd.s32 (!%p191_p9), 128, %v9717_v32  ;;  %v234_v42 = vand.u32 (!%p191_p9), 15, %v9717_v32  ;;  %v770_v51 = vsel (!%p191_p9), %vm295_vm1, %v283_v49, 0 }
  0x13   : > { %v9759_v55 = vand.u32 (!%p191_p9), 4294901760, %v770_v51  ;;  %vm3225_vm13 = vcmask (!%p191_p9), 924672   ;;  %vm3723_vm14 = vcmask (!%p191_p9), 916480   ;;  %vm4211_vm15 = vcmask (!%p191_p9), 908288  }
  0x14   : > { %v373_v15 = vand.u32 (!%p191_p9), 4294901760, %v372_v13  ;;  %v241_v37 = vand.u32 (!%p191_p9), 15, %v9720_v36  ;;  %vm9740_vm7 = vcmp.ge.s32.totalorder (!%p191_p9), %v234_v42, 1  ;;  %vm9792_vm10 = vcmp.le.s32.totalorder (!%p191_p9), %v234_v42, 14 }
  0x15   : > { %s219_s30 = scalar_select %p218_p10, %s9638_s22, 1  ;;  %v846_v58 = vsub.f32 %v770_v51, %v9759_v55 }
  0x16   : > { %v2719_v12 = vld [vmem:[#allocation2 + $0xc] sm:$0xf]  ;;  %v374_v20 = vsub.f32 %v372_v13, %v373_v15  ;;  %vm9727_vm6 = vcmp.ge.s32.totalorder %v241_v37, 1  ;;  %vm9780_vm9 = vcmp.le.s32.totalorder %v241_v37, 14 }
  0x17   : > { %s9245_s6 = sshll.u32 %s219_s30, 3  ;;  %v3215_v54 = vld [vmem:[#allocation2 + $0xc] sm:$0xf]  ;;  %v847_v61 = vand.u32 4294901760, %v846_v58 }
  0x18   : > { %s9673_s9 = scalar_lea.vmem %s10208_s0, %s9245_s6  ;;  %v375_v26 = vand.u32 4294901760, %v374_v20  ;;  %v3711_v20 = vld [vmem:[#allocation2 + $0xc] sm:$0xf]  ;;  %s9583_s6 = smov 112  }
  0x19   : > { %v258_v1 = vld [vmem:[%s9673_s9] sm:$0xff]  ;;  %v4201_v51 = vld [vmem:[#allocation2 + $0xc] sm:$0xf] }
  0x1a   : > { %v9676_v2 = vmax.f32 %v258_v1, 0.0  ;;  %v848_v1 = vsub.f32 %v846_v58, %v847_v61 }
  0x1c   : > { %260 = vst [vmem:[#allocation2 + $0x4] sm:$0xff] %v9676_v2  ;;  %v9698_v10 = vcombine.high %v9676_v2, %v9676_v2 }
  0x23   : > { %v261_v3 = vld [vmem:[#allocation2] sm:$0xff]  ;;  %v262_v5 = vld [vmem:[#allocation2 + $0x8] sm:$0xf] }
  0x24   : > { %286 = vrot.lane.b32.xlu1 %v261_v3, %s9577_s10  ;;  %v269_v4 = vcombine.high %v261_v3, %v261_v3  ;;  %v1244_v6 = vld [vmem:[#allocation2 + $0x8] sm:$0xf] }
  0x25   : > { %v1744_v7 = vld [vmem:[#allocation2 + $0x8] sm:$0xf] }
  0x26   : > { %288 = vrot.lane.b32.xlu0 %v269_v4, %s9577_s10 }
  0x28   : > { %272 = vrot.lane.b32.xlu1 %v269_v4, %s9578_s11 }
  0x2a   : > { %290 = vrot.lane.b32.xlu0 %v262_v5, %s9577_s10 }
  0x2c   : > { %270 = vrot.lane.b32.xlu1 %v261_v3, %s9578_s11 }
  0x2e   : > { %274 = vrot.lane.b32.xlu0 %v262_v5, %s9578_s11 }
  0x30   : > { %1256 = vrot.lane.b32.xlu1 %v1244_v6, %s9579_s12 }
  0x32   : > { %1254 = vrot.lane.b32.xlu0 %v269_v4, %s9579_s12 }
  0x34   : > { %1750 = vrot.lane.b32.xlu1 %v269_v4, %s9580_s13  ;;  %v849_v4 = vand.u32 4294901760, %v848_v1 }
  0x36   : > { %1252 = vrot.lane.b32.xlu0 %v261_v3, %s9579_s12 }
  0x38   : > { %1748 = vrot.lane.b32.xlu1 %v261_v3, %s9580_s13 }
  0x3a   : > { %1752 = vrot.lane.b32.xlu0 %v1744_v7, %s9580_s13 }
  0x3c   : > { %2727 = vrot.lane.b32.xlu1 %v2719_v12, %s9581_s16 }
  0x3e   : > { %2725 = vrot.lane.b32.xlu0 %v9698_v10, %s9581_s16 }
  0x40   : > { %3221 = vrot.lane.b32.xlu1 %v9698_v10, %s9582_s25 }
  0x42   : > { %2723 = vrot.lane.b32.xlu0 %v9676_v2, %s9581_s16 }
  0x44   : > { %3219 = vrot.lane.b32.xlu1 %v9676_v2, %s9582_s25 }
  0x46   : > { %3223 = vrot.lane.b32.xlu0 %v3215_v54, %s9582_s25 }
  0x48   : > { %3721 = vrot.lane.b32.xlu1 %v3711_v20, %s9583_s6 }
  0x4a   : > { %3719 = vrot.lane.b32.xlu0 %v9698_v10, %s9583_s6 }
  0x4c   : > { %4207 = vrot.lane.b32.xlu1 %v9698_v10, %s9584_s14 }
  0x4e   : > { %3717 = vrot.lane.b32.xlu0 %v9676_v2, %s9583_s6 }
  0x50   : > { %4205 = vrot.lane.b32.xlu1 %v9676_v2, %s9584_s14 }
  0x52   : > { %4209 = vrot.lane.b32.xlu0 %v4201_v51, %s9584_s14 }
  0x96   : > { %v287_v14 = vpop.permute.xlu1 %286 }
  0x98   : > { %v289_v16 = vpop.permute.xlu0 %288 }
  0x99   : > { %v293_v17 = vsel %vm292_vm3, %v287_v14, %v289_v16 }
  0x9a   : > { %v300_v18 = vsel %vm299_vm4, %v293_v17, 0  ;;  %v273_v39 = vpop.permute.xlu1 %272  ;;  %v9225_v17 = vld [vmem:[%s10209_s1 + $0x8] sm:$0xf] }
  0x9b   : > { %v9710_v19 = vand.u32 4294901760, %v300_v18 }
  0x9c   : > { %v291_v21 = vpop.permute.xlu0 %290 }
  0x9d   : > { %v389_v22 = vsub.f32 %v300_v18, %v9710_v19  ;;  %v294_v23 = vsel %vm292_vm3, %v289_v16, %v291_v21 }
  0x9e   : > { %v302_v24 = vsel %vm299_vm4, %v294_v23, 0  ;;  %v271_v44 = vpop.permute.xlu1 %270 }
  0x9f   : > { %v304_v25 = vand.u32 4294901760, %v302_v24  ;;  %v390_v27 = vand.u32 4294901760, %v389_v22  ;;  %v277_v47 = vsel %vm276_vm5, %v271_v44, %v273_v39 }
  0xa0   : > { %v275_v38 = vpop.permute.xlu0 %274  ;;  %v281_v50 = vsel %vm9740_vm7, %v277_v47, 0.0 }
  0xa1   : > { %v383_v29 = vsub.f32 %v302_v24, %v304_v25  ;;  %305 = vmatprep.subr.mxu0 %v304_v25  ;;  %v391_v31 = vsub.f32 %v389_v22, %v390_v27  ;;  %v278_v41 = vsel %vm276_vm5, %v273_v39, %v275_v38  ;;  %v773_v52 = vsel %vm299_vm4, %v281_v50, 0 }
  0xa2   : > { %307 = vmatpush1.msra.mxu0 %v9710_v19  ;;  %v282_v43 = vsel %vm9727_vm6, %v278_v41, 0.0  ;;  %v9761_v56 = vand.u32 4294901760, %v773_v52  ;;  %v1257_v6 = vpop.permute.xlu1 %1256 }
  0xa3   : > { %376 = vmatmul.mubr.f32.vlgmr.msra.gmra.mrb[0].mxu0 %v375_v26  ;;  %v384_v30 = vand.u32 4294901760, %v383_v29  ;;  %v392_v35 = vand.u32 4294901760, %v391_v31  ;;  %v776_v45 = vsel %vm299_vm4, %v282_v43, 0 }
  0xa4   : > { %456 = vmatprep.mubr.f32.mxu0 %v9576_v0  ;;  %v9745_v48 = vand.u32 4294901760, %v776_v45  ;;  %v863_v59 = vsub.f32 %v773_v52, %v9761_v56  ;;  %v1255_v7 = vpop.permute.xlu0 %1254 }
  0xa5   : > { %v385_v33 = vsub.f32 %v383_v29, %v384_v30  ;;  %v1260_v9 = vsel %vm1258_vm8, %v1255_v7, %v1257_v6 }
  0xa6   : > { %v857_v53 = vsub.f32 %v776_v45, %v9745_v48  ;;  %v864_v62 = vand.u32 4294901760, %v863_v59  ;;  %v1751_v37 = vpop.permute.xlu1 %1750  ;;  %v9226_v45 = vld [vmem:[%s10209_s1 + $0xc] sm:$0xf] }
  0xa7   : > { %v386_v34 = vand.u32 4294901760, %v385_v33 }
  0xa8   : > { %v858_v57 = vand.u32 4294901760, %v857_v53  ;;  %v865_v3 = vsub.f32 %v863_v59, %v864_v62  ;;  %v1253_v12 = vpop.permute.xlu0 %1252 }
  0xa9   : > { %387 = vmatprep.subr.mxu0 %v386_v34 }
  0xaa   : > { %393 = vmatpush1.msra.mxu0 %v392_v35  ;;  %v859_v60 = vsub.f32 %v857_v53, %v858_v57  ;;  %v866_v5 = vand.u32 4294901760, %v865_v3  ;;  %v1749_v41 = vpop.permute.xlu1 %1748  ;;  %v2249_v3 = vsel %vm299_vm4, %v9698_v10, 0 }
  0xab   : > { %458 = vmatmul.mubr.f32.vlgmr.msra.gmra.mrb[0].mxu0 %v9700_v11  ;;  %466 = vmatprep.subr.mxu0 %v383_v29  ;;  %v1755_v43 = vsel %vm1754_vm11, %v1749_v41, %v1751_v37 }
  0xac   : > { %469 = vmatpush1.msra.mxu0 %v389_v22  ;;  %532 = vmatprep.mubr.f32.mxu0 %v9576_v0  ;;  %v860_v63 = vand.u32 4294901760, %v859_v60  ;;  %v1753_v36 = vpop.permute.xlu0 %1752  ;;  %v1759_v47 = vsel %vm9740_vm7, %v1755_v43, 0.0 }
  0xad   : > { %542 = vmatprep.subr.mxu0 %v304_v25  ;;  %v1756_v38 = vsel %vm1754_vm11, %v1751_v37, %v1753_v36  ;;  %v1767_v49 = vsel %vm299_vm4, %v1759_v47, 0 }
  0xae   : > { %v1760_v39 = vsel %vm9727_vm6, %v1756_v38, 0.0 }
  0xaf   : > { %v1770_v42 = vsel %vm299_vm4, %v1760_v39, 0 }
  0xb0   : > { %v1772_v44 = vand.u32 4294901760, %v1770_v42 }
  0xb2   : > { %v1851_v50 = vsub.f32 %v1770_v42, %v1772_v44 }
  0xb3   : > { %535 = vmatmul.mubr.f32.vlgmr.msra.gmra.mrb[0].mxu0 %v372_v13 }
  0xb4   : > { %544 = vmatpush1.msra.mxu0 %v9710_v19  ;;  %607 = vmatprep.mubr.f32.mxu0 %v9576_v0  ;;  %v1852_v54 = vand.u32 4294901760, %v1851_v50 }
  0xb5   : > { %620 = vmatprep.subr.mxu0 %v384_v30 }
  0xbb   : > { %611 = vmatmul.mubr.f32.vlgmr.msra.gmra.mrb[0].mxu0 %v373_v15  ;;  %v1259_v15 = vsel %vm1258_vm8, %v1253_v12, %v1255_v7  ;;  %v2247_v7 = vsel %vm299_vm4, %v9676_v2, 0 }
  0xbc   : > { %624 = vmatpush1.msra.mxu0 %v390_v27  ;;  %687 = vmatprep.mubr.f32.mxu0 %v9576_v0  ;;  %v1263_v18 = vsel %vm9792_vm10, %v1259_v15, 0.0  ;;  %v2253_v12 = vand.u32 4294901760, %v2247_v7 }
  0xbd   : > { %696 = vmatprep.subr.mxu0 %v304_v25  ;;  %v1271_v22 = vsel %vm299_vm4, %v1263_v18, 0 }
  0xbe   : > { %v1278_v24 = vand.u32 4294901760, %v1271_v22  ;;  %v2336_v15 = vsub.f32 %v2247_v7, %v2253_v12 }
  0xc0   : > { %v1361_v27 = vsub.f32 %v1271_v22, %v1278_v24  ;;  %v2337_v18 = vand.u32 4294901760, %v2336_v15 }
  0xc2   : > { %v1362_v30 = vand.u32 4294901760, %v1361_v27  ;;  %v2338_v2 = vsub.f32 %v2336_v15, %v2337_v18 }
  0xc3   : > { %689 = vmatmul.mubr.f32.vlgmr.msra.gmra.mrb[0].mxu0 %v9700_v11 }
  0xc4   : > { %698 = vmatpush1.msra.mxu0 %v9710_v19  ;;  %761 = vmatprep.mubr.f32.mxu0 %v9576_v0  ;;  %v1268_v19 = vsel %vm295_vm1, %v9225_v17, 0  ;;  %v1363_v33 = vsub.f32 %v1361_v27, %v1362_v30  ;;  %v2339_v22 = vand.u32 4294901760, %v2338_v2 }
  0xc5   : > { %779 = vmatprep.subr.mxu0 %v9745_v48  ;;  %v9812_v23 = vand.u32 4294901760, %v1268_v19 }
  0xc6   : > { %v1364_v35 = vand.u32 4294901760, %v1363_v33 }
  0xc7   : > { %v1344_v26 = vsub.f32 %v1268_v19, %v9812_v23 }
  0xc9   : > { %v1345_v29 = vand.u32 4294901760, %v1344_v26 }
  0xcb   : > { %763 = vmatmul.mubr.f32.vlgmr.msra.gmra.mrb[0].mxu0 %v9700_v11  ;;  %v1264_v11 = vsel %vm9780_vm9, %v1260_v9, 0.0  ;;  %v1346_v32 = vsub.f32 %v1344_v26, %v1345_v29 }
  0xcc   : > { %781 = vmatpush1.msra.mxu0 %v9761_v56  ;;  %844 = vmatprep.mubr.f32.mxu0 %v9576_v0  ;;  %v1274_v13 = vsel %vm299_vm4, %v1264_v11, 0 }
  0xcd   : > { %861 = vmatprep.subr.mxu0 %v860_v63  ;;  %v9797_v16 = vand.u32 4294901760, %v1274_v13  ;;  %v1347_v34 = vand.u32 4294901760, %v1346_v32 }
  0xcf   : > { %v1355_v21 = vsub.f32 %v1274_v13, %v9797_v16 }
  0xd1   : > { %v1356_v25 = vand.u32 4294901760, %v1355_v21 }
  0xd3   : > { %850 = vmatmul.mubr.f32.vlgmr.msra.gmra.mrb[0].mxu0 %v849_v4  ;;  %v1357_v28 = vsub.f32 %v1355_v21, %v1356_v25  ;;  %v2251_v4 = vand.u32 4294901760, %v2249_v3 }
  0xd4   : > { %867 = vmatpush1.msra.mxu0 %v866_v5  ;;  %930 = vmatprep.mubr.f32.mxu0 %v9576_v0  ;;  %v9227_v5 = vld [vmem:[%s10209_s1 + $0x10] sm:$0xf] }
  0xd5   : > { %940 = vmatprep.subr.mxu0 %v857_v53  ;;  %v1358_v31 = vand.u32 4294901760, %v1357_v28  ;;  %v1774_v53 = vand.u32 4294901760, %v1767_v49  ;;  %v2245_v6 = vsel %vm295_vm1, %v9227_v5, 0  ;;  %v2330_v9 = vsub.f32 %v2249_v3, %v2251_v4 }
  0xd6   : > { %v9863_v11 = vand.u32 4294901760, %v2245_v6 }
  0xd7   : > { %v2331_v10 = vand.u32 4294901760, %v2330_v9 }
  0xd8   : > { %v2319_v13 = vsub.f32 %v2245_v6, %v9863_v11 }
  0xda   : > { %v2320_v17 = vand.u32 4294901760, %v2319_v13 }
  0xdb   : > { %932 = vmatmul.mubr.f32.vlgmr.msra.gmra.mrb[0].mxu0 %v9759_v55 }
  0xdc   : > { %943 = vmatpush1.msra.mxu0 %v863_v59  ;;  %1006 = vmatprep.mubr.f32.mxu0 %v9576_v0  ;;  %v2321_v20 = vsub.f32 %v2319_v13, %v2320_v17 }
  0xdd   : > { %1016 = vmatprep.subr.mxu0 %v9745_v48 }
  0xe3   : > { %1009 = vmatmul.mubr.f32.vlgmr.msra.gmra.mrb[0].mxu0 %v846_v58 }
  0xe4   : > { %1018 = vmatpush1.msra.mxu0 %v9761_v56  ;;  %1081 = vmatprep.mubr.f32.mxu0 %v9576_v0 }
  0xe5   : > { %1094 = vmatprep.subr.mxu0 %v858_v57  ;;  %v1853_v57 = vsub.f32 %v1851_v50, %v1852_v54 }
  0xe7   : > { %v1854_v60 = vand.u32 4294901760, %v1853_v57 }
  0xeb   : > { %1085 = vmatmul.mubr.f32.vlgmr.msra.gmra.mrb[0].mxu0 %v847_v61 }
  0xec   : > { %1098 = vmatpush1.msra.mxu0 %v864_v62  ;;  %1161 = vmatprep.mubr.f32.mxu0 %v9576_v0 }
  0xed   : > { %1170 = vmatprep.subr.mxu0 %v9745_v48  ;;  %v1764_v48 = vsel %vm295_vm1, %v9226_v45, 0 }
  0xee   : > { %v1839_v52 = vand.u32 4294901760, %v1764_v48 }
  0xf3   : > { %1163 = vmatmul.mubr.f32.vlgmr.msra.gmra.mrb[0].mxu0 %v9759_v55 }
  0xf4   : > { %1172 = vmatpush1.msra.mxu0 %v9761_v56  ;;  %1235 = vmatprep.mubr.f32.mxu0 %v9576_v0  ;;  %v1857_v56 = vsub.f32 %v1767_v49, %v1774_v53 }
  0xf5   : > { %1277 = vmatprep.subr.mxu0 %v9797_v16 }
  0xf6   : > { %v1858_v59 = vand.u32 4294901760, %v1857_v56 }
  0xf8   : > { %v1859_v62 = vsub.f32 %v1857_v56, %v1858_v59 }
  0xfa   : > { %v1860_v1 = vand.u32 4294901760, %v1859_v62 }
  0xfb   : > { %1237 = vmatmul.mubr.f32.vlgmr.msra.gmra.mrb[0].mxu0 %v9759_v55  ;;  %v1840_v55 = vsub.f32 %v1764_v48, %v1839_v52 }
  0xfc   : > { %1279 = vmatpush1.msra.mxu0 %v1278_v24  ;;  %1342 = vmatprep.mubr.f32.mxu0 %v9576_v0 }
  0xfd   : > { %1359 = vmatprep.subr.mxu0 %v1358_v31  ;;  %v1841_v58 = vand.u32 4294901760, %v1840_v55  ;;  %v9228_v31 = vld [vmem:[%s10209_s1 + $0x14] sm:$0xf] }
  0xfe   : > { %v2739_v33 = vsel %vm295_vm1, %v9228_v31, 0 }
  0xff   : > { %v1842_v61 = vsub.f32 %v1840_v55, %v1841_v58  ;;  %v9885_v36 = vand.u32 4294901760, %v2739_v33 }
 0x101   : > { %v1843_v63 = vand.u32 4294901760, %v1842_v61  ;;  %v2815_v39 = vsub.f32 %v2739_v33, %v9885_v36 }
 0x103   : > { %1348 = vmatmul.mubr.f32.vlgmr.msra.gmra.mrb[0].mxu0 %v1347_v34  ;;  %v2816_v43 = vand.u32 4294901760, %v2815_v39 }
 0x104   : > { %1365 = vmatpush1.msra.mxu0 %v1364_v35  ;;  %1428 = vmatprep.mubr.f32.mxu0 %v9576_v0 }
 0x105   : > { %1438 = vmatprep.subr.mxu0 %v1355_v21  ;;  %v2322_v21 = vand.u32 4294901760, %v2321_v20  ;;  %v2817_v47 = vsub.f32 %v2815_v39, %v2816_v43 }
 0x107   : > { %v2818_v49 = vand.u32 4294901760, %v2817_v47 }
 0x10b   : > { %1430 = vmatmul.mubr.f32.vlgmr.msra.gmra.mrb[0].mxu0 %v9812_v23 }
 0x10c   : > { %1441 = vmatpush1.msra.mxu0 %v1361_v27  ;;  %1504 = vmatprep.mubr.f32.mxu0 %v9576_v0 }
 0x10d   : > { %1514 = vmatprep.subr.mxu0 %v9797_v16 }
 0x113   : > { %1507 = vmatmul.mubr.f32.vlgmr.msra.gmra.mrb[0].mxu0 %v1344_v26 }
 0x114   : > { %1516 = vmatpush1.msra.mxu0 %v1278_v24  ;;  %1579 = vmatprep.mubr.f32.mxu0 %v9576_v0 }
 0x115   : > { %1592 = vmatprep.subr.mxu0 %v1356_v25 }
 0x11b   : > { %1583 = vmatmul.mubr.f32.vlgmr.msra.gmra.mrb[0].mxu0 %v1345_v29 }
 0x11c   : > { %1596 = vmatpush1.msra.mxu0 %v1362_v30  ;;  %1659 = vmatprep.mubr.f32.mxu0 %v9576_v0 }
 0x11d   : > { %1668 = vmatprep.subr.mxu0 %v9797_v16  ;;  %v2332_v16 = vsub.f32 %v2330_v9, %v2331_v10 }
 0x11f   : > { %v2333_v19 = vand.u32 4294901760, %v2332_v16 }
 0x123   : > { %1661 = vmatmul.mubr.f32.vlgmr.msra.gmra.mrb[0].mxu0 %v9812_v23 }
 0x124   : > { %1670 = vmatpush1.msra.mxu0 %v1278_v24  ;;  %1733 = vmatprep.mubr.f32.mxu0 %v9576_v0  ;;  %v2726_v24 = vpop.permute.xlu0 %2725 }
 0x125   : > { %1773 = vmatprep.subr.mxu0 %v1772_v44 }
 0x128   : > { %v2724_v27 = vpop.permute.xlu0 %2723 }
 0x129   : > { %v2730_v29 = vsel %vm2729_vm12, %v2724_v27, %v2726_v24 }
 0x12a   : > { %v2734_v32 = vsel %vm9792_vm10, %v2730_v29, 0.0 }
 0x12b   : > { %1735 = vmatmul.mubr.f32.vlgmr.msra.gmra.mrb[0].mxu0 %v9812_v23  ;;  %v2728_v23 = vpop.permute.xlu1 %2727  ;;  %v2742_v35 = vsel %vm299_vm4, %v2734_v32, 0 }
 0x12c   : > { %1775 = vmatpush1.msra.mxu0 %v1774_v53  ;;  %1838 = vmatprep.mubr.f32.mxu0 %v9576_v0  ;;  %v2731_v25 = vsel %vm2729_vm12, %v2726_v24, %v2728_v23  ;;  %v2749_v37 = vand.u32 4294901760, %v2742_v35  ;;  %v3224_v51 = vpop.permute.xlu0 %3223  ;;  %v9230_v24 = vld [vmem:[%s10209_s1 + $0x1c] sm:$0xf] }
 0x12d   : > { %1855 = vmatprep.subr.mxu0 %v1854_v60  ;;  %v2735_v26 = vsel %vm9780_vm9, %v2731_v25, 0.0 }
 0x12e   : > { %v2745_v28 = vsel %vm299_vm4, %v2735_v26, 0  ;;  %v2832_v41 = vsub.f32 %v2742_v35, %v2749_v37  ;;  %v3727_v26 = vsel %vm295_vm1, %v9230_v24, 0  ;;  %v7155_v24 = vld [vmem:[#allocation2 + $0xc] sm:$0xf] }
 0x12f   : > { %v2747_v30 = vand.u32 4294901760, %v2745_v28  ;;  %v9932_v29 = vand.u32 4294901760, %v3727_v26 }
 0x130   : > { %v3720_v20 = vpop.permute.xlu0 %3719 }
 0x131   : > { %v2826_v34 = vsub.f32 %v2745_v28, %v2747_v30  ;;  %v3801_v32 = vsub.f32 %v3727_v26, %v9932_v29  ;;  %v8145_v26 = vld [vmem:[#allocation2 + $0xc] sm:$0xf] }
 0x133   : > { %1844 = vmatmul.mubr.f32.vlgmr.msra.gmra.mrb[0].mxu0 %v1843_v63  ;;  %v2827_v38 = vand.u32 4294901760, %v2826_v34  ;;  %v3802_v35 = vand.u32 4294901760, %v3801_v32 }
 0x134   : > { %1861 = vmatpush1.msra.mxu0 %v1860_v1  ;;  %1924 = vmatprep.mubr.f32.mxu0 %v9576_v0 }
 0x135   : > { %1934 = vmatprep.subr.mxu0 %v1851_v50  ;;  %v2828_v42 = vsub.f32 %v2826_v34, %v2827_v38 }
 0x137   : > { %v2829_v45 = vand.u32 4294901760, %v2828_v42 }
 0x13b   : > { %1926 = vmatmul.mubr.f32.vlgmr.msra.gmra.mrb[0].mxu0 %v1839_v52 }
 0x13c   : > { %1937 = vmatpush1.msra.mxu0 %v1857_v56  ;;  %2000 = vmatprep.mubr.f32.mxu0 %v9576_v0 }
 0x13d   : > { %2010 = vmatprep.subr.mxu0 %v1772_v44 }
 0x143   : > { %2003 = vmatmul.mubr.f32.vlgmr.msra.gmra.mrb[0].mxu0 %v1840_v55 }
 0x144   : > { %2012 = vmatpush1.msra.mxu0 %v1774_v53  ;;  %2075 = vmatprep.mubr.f32.mxu0 %v9576_v0 }
 0x145   : > { %2088 = vmatprep.subr.mxu0 %v1852_v54 }
 0x14b   : > { %2079 = vmatmul.mubr.f32.vlgmr.msra.gmra.mrb[0].mxu0 %v1841_v58 }
 0x14c   : > { %2092 = vmatpush1.msra.mxu0 %v1858_v59  ;;  %2155 = vmatprep.mubr.f32.mxu0 %v9576_v0  ;;  %v9229_v59 = vld [vmem:[%s10209_s1 + $0x18] sm:$0xf] }
 0x14d   : > { %2164 = vmatprep.subr.mxu0 %v1772_v44  ;;  %v2833_v44 = vand.u32 4294901760, %v2832_v41  ;;  %v3235_v61 = vsel %vm295_vm1, %v9229_v59, 0 }
 0x14e   : > { %v9909_v1 = vand.u32 4294901760, %v3235_v61 }
 0x14f   : > { %v2834_v48 = vsub.f32 %v2832_v41, %v2833_v44 }
 0x150   : > { %v3311_v5 = vsub.f32 %v3235_v61, %v9909_v1 }
 0x151   : > { %v2835_v50 = vand.u32 4294901760, %v2834_v48 }
 0x153   : > { %2157 = vmatmul.mubr.f32.vlgmr.msra.gmra.mrb[0].mxu0 %v1839_v52 }
 0x154   : > { %2166 = vmatpush1.msra.mxu0 %v1774_v53  ;;  %2229 = vmatprep.mubr.f32.mxu0 %v9576_v0 }
 0x155   : > { %2252 = vmatprep.subr.mxu0 %v2251_v4 }
 0x15b   : > { %2231 = vmatmul.mubr.f32.vlgmr.msra.gmra.mrb[0].mxu0 %v1839_v52  ;;  %v3222_v52 = vpop.permute.xlu1 %3221 }
 0x15c   : > { %2254 = vmatpush1.msra.mxu0 %v2253_v12  ;;  %2317 = vmatprep.mubr.f32.mxu0 %v9576_v0  ;;  %v3227_v53 = vsel %vm3225_vm13, %v3222_v52, %v3224_v51 }
 0x15d   : > { %2334 = vmatprep.subr.mxu0 %v2333_v19  ;;  %v3231_v54 = vsel %vm9727_vm6, %v3227_v53, 0.0 }
 0x15e   : > { %v3241_v56 = vsel %vm299_vm4, %v3231_v54, 0 }
 0x15f   : > { %v3220_v55 = vpop.permute.xlu1 %3219  ;;  %v3243_v58 = vand.u32 4294901760, %v3241_v56 }
 0x160   : > { %v3226_v57 = vsel %vm3225_vm13, %v3220_v55, %v3222_v52  ;;  %v9231_v52 = vld [vmem:[%s10209_s1 + $0x20] sm:$0xf] }
 0x161   : > { %v3230_v60 = vsel %vm9740_vm7, %v3226_v57, 0.0  ;;  %v3322_v63 = vsub.f32 %v3241_v56, %v3243_v58  ;;  %v4221_v54 = vsel %vm295_vm1, %v9231_v52, 0 }
 0x162   : > { %v3238_v62 = vsel %vm299_vm4, %v3230_v60, 0  ;;  %v4296_v57 = vand.u32 4294901760, %v4221_v54 }
 0x163   : > { %2323 = vmatmul.mubr.f32.vlgmr.msra.gmra.mrb[0].mxu0 %v2322_v21  ;;  %v3245_v3 = vand.u32 4294901760, %v3238_v62  ;;  %v3722_v19 = vpop.permute.xlu1 %3721 }
 0x164   : > { %2340 = vmatpush1.msra.mxu0 %v2339_v22  ;;  %2403 = vmatprep.mubr.f32.mxu0 %v9576_v0  ;;  %v3725_v2 = vsel %vm3723_vm14, %v3720_v20, %v3722_v19  ;;  %v3718_v22 = vpop.permute.xlu0 %3717  ;;  %v4297_v60 = vsub.f32 %v4221_v54, %v4296_v57 }
 0x165   : > { %2413 = vmatprep.subr.mxu0 %v2330_v9  ;;  %v3328_v6 = vsub.f32 %v3238_v62, %v3245_v3  ;;  %v3312_v9 = vand.u32 4294901760, %v3311_v5  ;;  %v3731_v21 = vsel %vm299_vm4, %v3725_v2, 0  ;;  %v3724_v25 = vsel %vm3723_vm14, %v3718_v22, %v3720_v20 }
 0x166   : > { %v3733_v23 = vand.u32 4294901760, %v3731_v21  ;;  %v3729_v28 = vsel %vm299_vm4, %v3724_v25, 0  ;;  %v8634_v25 = vld [vmem:[#allocation2 + $0xc] sm:$0xf] }
 0x168   : > { %v3812_v27 = vsub.f32 %v3731_v21, %v3733_v23 }
 0x16a   : > { %v3813_v31 = vand.u32 4294901760, %v3812_v27 }
 0x16b   : > { %2405 = vmatmul.mubr.f32.vlgmr.msra.gmra.mrb[0].mxu0 %v9863_v11 }
 0x16c   : > { %2416 = vmatpush1.msra.mxu0 %v2336_v15  ;;  %2479 = vmatprep.mubr.f32.mxu0 %v9576_v0 }
 0x16d   : > { %2489 = vmatprep.subr.mxu0 %v2251_v4 }
 0x173   : > { %2482 = vmatmul.mubr.f32.vlgmr.msra.gmra.mrb[0].mxu0 %v2319_v13 }
 0x174   : > { %2491 = vmatpush1.msra.mxu0 %v2253_v12  ;;  %2554 = vmatprep.mubr.f32.mxu0 %v9576_v0 }
 0x175   : > { %2567 = vmatprep.subr.mxu0 %v2331_v10  ;;  %v3313_v10 = vsub.f32 %v3311_v5, %v3312_v9 }
 0x177   : > { %v3314_v15 = vand.u32 4294901760, %v3313_v10 }
 0x17b   : > { %2558 = vmatmul.mubr.f32.vlgmr.msra.gmra.mrb[0].mxu0 %v2320_v17  ;;  %v4696_v17 = vld [vmem:[%s10210_s2] sm:$0xf] }
 0x17c   : > { %2571 = vmatpush1.msra.mxu0 %v2337_v18  ;;  %2634 = vmatprep.mubr.f32.mxu0 %v9576_v0  ;;  %v9585_v18 = vmov 0  }
 0x17d   : > { %2643 = vmatprep.subr.mxu0 %v2251_v4  ;;  %v3323_v4 = vand.u32 4294901760, %v3322_v63  ;;  %9508 = vset.pattern.permute.xlu0 %v9585_v18 }
 0x17e   : > { %4699 = vperm.xlu0 %9508, %v4696_v17  }
 0x17f   : > { %v3324_v7 = vsub.f32 %v3322_v63, %v3323_v4 }
 0x183   : > { %2636 = vmatmul.mubr.f32.vlgmr.msra.gmra.mrb[0].mxu0 %v9863_v11 }
 0x184   : > { %2645 = vmatpush1.msra.mxu0 %v2253_v12  ;;  %2708 = vmatprep.mubr.f32.mxu0 %v9576_v0  ;;  %v3325_v12 = vand.u32 4294901760, %v3324_v7 }
 0x185   : > { %2748 = vmatprep.subr.mxu0 %v2747_v30 }
 0x18b   : > { %2710 = vmatmul.mubr.f32.vlgmr.msra.gmra.mrb[0].mxu0 %v9863_v11  ;;  %v3329_v11 = vand.u32 4294901760, %v3328_v6 }
 0x18c   : > { %2750 = vmatpush1.msra.mxu0 %v2749_v37  ;;  %2813 = vmatprep.mubr.f32.mxu0 %v9576_v0 }
 0x18d   : > { %2830 = vmatprep.subr.mxu0 %v2829_v45  ;;  %v3330_v13 = vsub.f32 %v3328_v6, %v3329_v11 }
 0x18f   : > { %v3331_v16 = vand.u32 4294901760, %v3330_v13 }
 0x193   : > { %2819 = vmatmul.mubr.f32.vlgmr.msra.gmra.mrb[0].mxu0 %v2818_v49 }
 0x194   : > { %2836 = vmatpush1.msra.mxu0 %v2835_v50  ;;  %2899 = vmatprep.mubr.f32.mxu0 %v9576_v0 }
 0x195   : > { %2909 = vmatprep.subr.mxu0 %v2826_v34  ;;  %v3814_v34 = vsub.f32 %v3812_v27, %v3813_v31 }
 0x19b   : > { %2901 = vmatmul.mubr.f32.vlgmr.msra.gmra.mrb[0].mxu0 %v9885_v36 }
 0x19c   : > { %2912 = vmatpush1.msra.mxu0 %v2832_v41  ;;  %2975 = vmatprep.mubr.f32.mxu0 %v9576_v0 }
 0x19d   : > { %2985 = vmatprep.subr.mxu0 %v2747_v30 }
 0x1a3   : > { %2978 = vmatmul.mubr.f32.vlgmr.msra.gmra.mrb[0].mxu0 %v2815_v39 }
 0x1a4   : > { %2987 = vmatpush1.msra.mxu0 %v2749_v37  ;;  %3050 = vmatprep.mubr.f32.mxu0 %v9576_v0 }
 0x1a5   : > { %3063 = vmatprep.subr.mxu0 %v2827_v38  ;;  %v3803_v38 = vsub.f32 %v3801_v32, %v3802_v35 }
 0x1a7   : > { %v3804_v41 = vand.u32 4294901760, %v3803_v38 }
 0x1ab   : > { %3054 = vmatmul.mubr.f32.vlgmr.msra.gmra.mrb[0].mxu0 %v2816_v43  ;;  %v4210_v43 = vpop.permute.xlu0 %4209 }
 0x1ac   : > { %3067 = vmatpush1.msra.mxu0 %v2833_v44  ;;  %3130 = vmatprep.mubr.f32.mxu0 %v9576_v0  ;;  %v4208_v44 = vpop.permute.xlu1 %4207 }
 0x1ad   : > { %3139 = vmatprep.subr.mxu0 %v2747_v30  ;;  %v3735_v30 = vand.u32 4294901760, %v3729_v28  ;;  %v4213_v45 = vsel %vm4211_vm15, %v4208_v44, %v4210_v43 }
 0x1ae   : > { %v4217_v47 = vsel %vm9780_vm9, %v4213_v45, 0.0 }
 0x1af   : > { %v3818_v33 = vsub.f32 %v3729_v28, %v3735_v30  ;;  %v4227_v49 = vsel %vm299_vm4, %v4217_v47, 0  ;;  %v9232_v28 = vld [vmem:[%s10211_s3 + $0x4] sm:$0xf] }
 0x1b0   : > { %v4206_v48 = vpop.permute.xlu1 %4205  ;;  %v4229_v51 = vand.u32 4294901760, %v4227_v49 }
 0x1b1   : > { %v4212_v50 = vsel %vm4211_vm15, %v4206_v48, %v4208_v44 }
 0x1b2   : > { %v4216_v53 = vsel %vm9792_vm10, %v4212_v50, 0.0  ;;  %v4308_v56 = vsub.f32 %v4227_v49, %v4229_v51 }
 0x1b3   : > { %3132 = vmatmul.mubr.f32.vlgmr.msra.gmra.mrb[0].mxu0 %v9885_v36  ;;  %v4224_v55 = vsel %vm299_vm4, %v4216_v53, 0 }
 0x1b4   : > { %3141 = vmatpush1.msra.mxu0 %v2749_v37  ;;  %3204 = vmatprep.mubr.f32.mxu0 %v9576_v0  ;;  %v3815_v37 = vand.u32 4294901760, %v3814_v34  ;;  %v4309_v59 = vand.u32 4294901760, %v4308_v56 }
 0x1b5   : > { %3244 = vmatprep.subr.mxu0 %v3243_v58 }
 0x1b6   : > { %v4310_v62 = vsub.f32 %v4308_v56, %v4309_v59 }
 0x1bb   : > { %3206 = vmatmul.mubr.f32.vlgmr.msra.gmra.mrb[0].mxu0 %v9885_v36  ;;  %v3819_v36 = vand.u32 4294901760, %v3818_v33 }
 0x1bc   : > { %3246 = vmatpush1.msra.mxu0 %v3245_v3  ;;  %3309 = vmatprep.mubr.f32.mxu0 %v9576_v0 }
 0x1bd   : > { %3326 = vmatprep.subr.mxu0 %v3325_v12  ;;  %v3820_v39 = vsub.f32 %v3818_v33, %v3819_v36 }
 0x1bf   : > { %v3821_v42 = vand.u32 4294901760, %v3820_v39 }
 0x1c3   : > { %3315 = vmatmul.mubr.f32.vlgmr.msra.gmra.mrb[0].mxu0 %v3314_v15 }
 0x1c4   : > { %3332 = vmatpush1.msra.mxu0 %v3331_v16  ;;  %3395 = vmatprep.mubr.f32.mxu0 %v9576_v0 }
 0x1c5   : > { %3405 = vmatprep.subr.mxu0 %v3322_v63  ;;  %v4298_v63 = vand.u32 4294901760, %v4297_v60 }
 0x1cb   : > { %3397 = vmatmul.mubr.f32.vlgmr.msra.gmra.mrb[0].mxu0 %v9909_v1 }
 0x1cc   : > { %3408 = vmatpush1.msra.mxu0 %v3328_v6  ;;  %3471 = vmatprep.mubr.f32.mxu0 %v9576_v0 }
 0x1cd   : > { %3481 = vmatprep.subr.mxu0 %v3243_v58 }
 0x1d3   : > { %3474 = vmatmul.mubr.f32.vlgmr.msra.gmra.mrb[0].mxu0 %v3311_v5 }
 0x1d4   : > { %3483 = vmatpush1.msra.mxu0 %v3245_v3  ;;  %3546 = vmatprep.mubr.f32.mxu0 %v9576_v0 }
 0x1d5   : > { %3559 = vmatprep.subr.mxu0 %v3323_v4  ;;  %v4299_v4 = vsub.f32 %v4297_v60, %v4298_v63 }
 0x1d7   : > { %v4300_v6 = vand.u32 4294901760, %v4299_v4 }
 0x1db   : > { %3550 = vmatmul.mubr.f32.vlgmr.msra.gmra.mrb[0].mxu0 %v3312_v9 }
 0x1dc   : > { %3563 = vmatpush1.msra.mxu0 %v3329_v11  ;;  %3626 = vmatprep.mubr.f32.mxu0 %v9576_v0 }
 0x1dd   : > { %3635 = vmatprep.subr.mxu0 %v3243_v58  ;;  %v4231_v58 = vand.u32 4294901760, %v4224_v55 }
 0x1df   : > { %v4314_v61 = vsub.f32 %v4224_v55, %v4231_v58 }
 0x1e3   : > { %3628 = vmatmul.mubr.f32.vlgmr.msra.gmra.mrb[0].mxu0 %v9909_v1 }
 0x1e4   : > { %3637 = vmatpush1.msra.mxu0 %v3245_v3  ;;  %3700 = vmatprep.mubr.f32.mxu0 %v9576_v0  ;;  %v4311_v3 = vand.u32 4294901760, %v4310_v62 }
 0x1e5   : > { %3734 = vmatprep.subr.mxu0 %v3733_v23 }
 0x1eb   : > { %3702 = vmatmul.mubr.f32.vlgmr.msra.gmra.mrb[0].mxu0 %v9909_v1  ;;  %v4315_v1 = vand.u32 4294901760, %v4314_v61 }
 0x1ec   : > { %3736 = vmatpush1.msra.mxu0 %v3735_v30  ;;  %3799 = vmatprep.mubr.f32.mxu0 %v9576_v0 }
 0x1ed   : > { %3816 = vmatprep.subr.mxu0 %v3815_v37  ;;  %v4316_v5 = vsub.f32 %v4314_v61, %v4315_v1 }
 0x1ef   : > { %v4317_v7 = vand.u32 4294901760, %v4316_v5 }
 0x1f3   : > { %3805 = vmatmul.mubr.f32.vlgmr.msra.gmra.mrb[0].mxu0 %v3804_v41 }
 0x1f4   : > { %3822 = vmatpush1.msra.mxu0 %v3821_v42  ;;  %3885 = vmatprep.mubr.f32.mxu0 %v9576_v0 }
 0x1f5   : > { %3895 = vmatprep.subr.mxu0 %v3812_v27  ;;  %v9128_v27 = vld [vmem:[%s10212_s4] sm:$0xf] }
 0x1fb   : > { %3887 = vmatmul.mubr.f32.vlgmr.msra.gmra.mrb[0].mxu0 %v9932_v29 }
 0x1fc   : > { %3898 = vmatpush1.msra.mxu0 %v3818_v33  ;;  %3961 = vmatprep.mubr.f32.mxu0 %v9576_v0 }
 0x1fd   : > { %3971 = vmatprep.subr.mxu0 %v3733_v23  ;;  %v4700_v9 = vpop.permute.xlu0 %4699 }
 0x203   : > { %3964 = vmatmul.mubr.f32.vlgmr.msra.gmra.mrb[0].mxu0 %v3801_v32 }
 0x204   : > { %3973 = vmatpush1.msra.mxu0 %v3735_v30  ;;  %4036 = vmatprep.mubr.f32.mxu0 %v9576_v0 }
 0x205   : > { %4049 = vmatprep.subr.mxu0 %v3813_v31 }
 0x20b   : > { %4040 = vmatmul.mubr.f32.vlgmr.msra.gmra.mrb[0].mxu0 %v3802_v35 }
 0x20c   : > { %4053 = vmatpush1.msra.mxu0 %v3819_v36  ;;  %4116 = vmatprep.mubr.f32.mxu0 %v9576_v0 }
 0x20d   : > { %4125 = vmatprep.subr.mxu0 %v3733_v23  ;;  %v7650_v23 = vld [vmem:[#allocation2 + $0xc] sm:$0xf] }
 0x213   : > { %4118 = vmatmul.mubr.f32.vlgmr.msra.gmra.mrb[0].mxu0 %v9932_v29 }
 0x214   : > { %4127 = vmatpush1.msra.mxu0 %v3735_v30  ;;  %4190 = vmatprep.mubr.f32.mxu0 %v9576_v0 }
 0x215   : > { %4230 = vmatprep.subr.mxu0 %v4229_v51 }
 0x21b   : > { %4192 = vmatmul.mubr.f32.vlgmr.msra.gmra.mrb[0].mxu0 %v9932_v29  ;;  %v4740_v29 = vsel %vm295_vm1, %v9232_v28, 0  ;;  %v9233_v28 = vld [vmem:[%s10211_s3 + $0x8] sm:$0xf] }
 0x21c   : > { %4232 = vmatpush1.msra.mxu0 %v4231_v58  ;;  %4295 = vmatprep.mubr.f32.mxu0 %v9576_v0  ;;  %v10009_v30 = vand.u32 4294901760, %v4740_v29 }
 0x21d   : > { %4312 = vmatprep.subr.mxu0 %v4311_v3 }
 0x21e   : > { %v4814_v31 = vsub.f32 %v4740_v29, %v10009_v30 }
 0x220   : > { %v4815_v32 = vand.u32 4294901760, %v4814_v31 }
 0x222   : > { %v4816_v38 = vsub.f32 %v4814_v31, %v4815_v32 }
 0x223   : > { %4301 = vmatmul.mubr.f32.vlgmr.msra.gmra.mrb[0].mxu0 %v4300_v6 }
 0x224   : > { %4318 = vmatpush1.msra.mxu0 %v4317_v7  ;;  %4381 = vmatprep.mubr.f32.mxu0 %v9576_v0  ;;  %v4817_v45 = vand.u32 4294901760, %v4816_v38 }
 0x225   : > { %4391 = vmatprep.subr.mxu0 %v4308_v56 }
 0x22b   : > { %4383 = vmatmul.mubr.f32.vlgmr.msra.gmra.mrb[0].mxu0 %v4296_v57 }
 0x22c   : > { %4394 = vmatpush1.msra.mxu0 %v4314_v61  ;;  %4457 = vmatprep.mubr.f32.mxu0 %v9576_v0  ;;  %v4728_v61 = vld [vmem:[%s10211_s3] sm:$0xf] }
 0x22d   : > { %4467 = vmatprep.subr.mxu0 %v4229_v51 }
 0x233   : > { %4460 = vmatmul.mubr.f32.vlgmr.msra.gmra.mrb[0].mxu0 %v4297_v60 }
 0x234   : > { %4469 = vmatpush1.msra.mxu0 %v4231_v58  ;;  %4532 = vmatprep.mubr.f32.mxu0 %v9576_v0 }
 0x235   : > { %4545 = vmatprep.subr.mxu0 %v4309_v59 }
 0x23b   : > { %4536 = vmatmul.mubr.f32.vlgmr.msra.gmra.mrb[0].mxu0 %v4298_v63 }
 0x23c   : > { %4549 = vmatpush1.msra.mxu0 %v4315_v1  ;;  %4612 = vmatprep.mubr.f32.mxu0 %v9576_v0  ;;  %v5212_v1 = vsel %vm295_vm1, %v4728_v61, 0 }
 0x23d   : > { %4621 = vmatprep.subr.mxu0 %v4229_v51  ;;  %v5287_v5 = vand.u32 4294901760, %v5212_v1 }
 0x243   : > { %4614 = vmatmul.mubr.f32.vlgmr.msra.gmra.mrb[0].mxu0 %v4296_v57 }
 0x244   : > { %4623 = vmatpush1.msra.mxu0 %v4231_v58  ;;  %4686 = vmatprep.mubr.f32.mxu0 %v9576_v0 }
 0x24b   : > { %4688 = vmatmul.mubr.f32.vlgmr.msra.gmra.mrb[0].mxu0 %v4296_v57 }
 0x31e   : > { %v4689_v11 = vpop.f32.mrb[0].mxu0 }
 0x31f   : > { %v4702_v12 = vadd.f32 %v4700_v9, %v4689_v11  ;;  %v4691_v10 = vpop.f32.mrb[1].mxu0 }
 0x320   : > { %v4703_v13 = vadd.f32 %v4700_v9, %v4691_v10  ;;  %v5288_v9 = vsub.f32 %v5212_v1, %v5287_v5 }
 0x321   : > { %v4704_v15 = vmax.f32 %v4702_v12, 0.0 }
 0x322   : > { %v4705_v16 = vmax.f32 %v4703_v13, 0.0  ;;  %v5289_v10 = vand.u32 4294901760, %v5288_v9 }
 0x324   : > { %v9965_v17 = vcombine.low %v4704_v15, %v4705_v16  ;;  %v9978_v22 = vcombine.low %v4705_v16, %v4705_v16  ;;  %v5290_v16 = vsub.f32 %v5288_v9, %v5289_v10 }
 0x326   : > { %4710 = vst [vmem:[#allocation2 + $0x4] sm:$0xff] %v9965_v17 }
 0x32d   : > { %v4711_v18 = vld [vmem:[#allocation2] sm:$0xff]  ;;  %v4712_v20 = vld [vmem:[#allocation2 + $0x8] sm:$0xf] }
 0x32e   : > { %4731 = vrot.lane.b32.xlu0 %v4711_v18, %s9577_s10  ;;  %v4715_v19 = vcombine.high %v4711_v18, %v4711_v18  ;;  %v6181_v2 = vld [vmem:[#allocation2 + $0x8] sm:$0xf] }
 0x32f   : > { %v5686_v21 = vld [vmem:[#allocation2 + $0x8] sm:$0xf] }
 0x330   : > { %4733 = vrot.lane.b32.xlu1 %v4715_v19, %s9577_s10 }
 0x332   : > { %4720 = vrot.lane.b32.xlu0 %v4712_v20, %s9578_s11 }
 0x334   : > { %4735 = vrot.lane.b32.xlu1 %v4712_v20, %s9577_s10 }
 0x336   : > { %5692 = vrot.lane.b32.xlu0 %v4715_v19, %s9579_s12 }
 0x338   : > { %4718 = vrot.lane.b32.xlu1 %v4715_v19, %s9578_s11 }
 0x33a   : > { %5690 = vrot.lane.b32.xlu0 %v4711_v18, %s9579_s12 }
 0x33c   : > { %4716 = vrot.lane.b32.xlu1 %v4711_v18, %s9578_s11 }
 0x33e   : > { %6189 = vrot.lane.b32.xlu0 %v6181_v2, %s9580_s13 }
 0x340   : > { %5694 = vrot.lane.b32.xlu1 %v5686_v21, %s9579_s12 }
 0x342   : > { %7161 = vrot.lane.b32.xlu0 %v9978_v22, %s9581_s16 }
 0x344   : > { %6187 = vrot.lane.b32.xlu1 %v4715_v19, %s9580_s13  ;;  %v5291_v19 = vand.u32 4294901760, %v5290_v16  ;;  %v9235_v16 = vld [vmem:[%s10211_s3 + $0x10] sm:$0xf] }
 0x346   : > { %7159 = vrot.lane.b32.xlu0 %v9965_v17, %s9581_s16 }
 0x348   : > { %6185 = vrot.lane.b32.xlu1 %v4711_v18, %s9580_s13 }
 0x34a   : > { %7658 = vrot.lane.b32.xlu0 %v7650_v23, %s9582_s25 }
 0x34c   : > { %7163 = vrot.lane.b32.xlu1 %v7155_v24, %s9581_s16 }
 0x34e   : > { %8153 = vrot.lane.b32.xlu0 %v9978_v22, %s9583_s6 }
 0x350   : > { %7656 = vrot.lane.b32.xlu1 %v9978_v22, %s9582_s25 }
 0x352   : > { %8151 = vrot.lane.b32.xlu0 %v9965_v17, %s9583_s6 }
 0x354   : > { %7654 = vrot.lane.b32.xlu1 %v9965_v17, %s9582_s25  ;;  %s215_s25 = sand.u32 1, %s9566_s19  }
 0x355   : > { %s9144_s26 = scalar_lea.sflag [#allocation4], %s215_s25 }
 0x356   : > { %8642 = vrot.lane.b32.xlu0 %v8634_v25, %s9584_s14 }
 0x358   : > { %8155 = vrot.lane.b32.xlu1 %v8145_v26, %s9583_s6  ;;  %s9221_s6 = sshll.u32 %s215_s25, 3 }
 0x359   : > { %s217_s7 = scalar_lea.vmem [#allocation3], %s9221_s6 }
 0x35a   : > { %9131 = vperm.xlu0 %9508, %v9128_v27   ;;  %s9158_s8 = sshll.u32 %s217_s7, 4  ;;  %s10168_s8 = int_to_ptr.vmem [resolvable:$true] %s9158_s8 }
 0x35b   : > { %s9512_s30 = scalar_lea.vmem %s10168_s8, 128 }
 0x35c   : > { %8640 = vrot.lane.b32.xlu1 %v9978_v22, %s9584_s14  ;;  %p9513_p11 = scmp.ne.s32.totalorder %s10168_s8, %s9512_s30 }
 0x35e   : > { %p9514_p12 = pnand %p9513_p11, %p9655_p5 }
 0x360   : > { %8638 = vrot.lane.b32.xlu1 %v9965_v17, %s9584_s14  ;;  %s9246_s14 = sshll.u32 %s9638_s22, 7  ;;  %p9515_p13 = pneg %p9514_p12 }
 0x361   : > { %s10166_s23 = scalar_lea.hbm %s10213_s5, %s9246_s14  ;;  %s9586_s22 = smov [#allocation3]  }
 0x3a0   : > { %v4732_v33 = vpop.permute.xlu0 %4731 }
 0x3a2   : > { %v4734_v34 = vpop.permute.xlu1 %4733 }
 0x3a3   : > { %v4737_v35 = vsel %vm292_vm3, %v4732_v33, %v4734_v34 }
 0x3a4   : > { %v4742_v36 = vsel %vm299_vm4, %v4737_v35, 0  ;;  %v4721_v55 = vpop.permute.xlu0 %4720 }
 0x3a5   : > { %v4748_v37 = vand.u32 4294901760, %v4742_v36 }
 0x3a6   : > { %v4736_v39 = vpop.permute.xlu1 %4735 }
 0x3a7   : > { %v4831_v41 = vsub.f32 %v4742_v36, %v4748_v37  ;;  %v4738_v42 = vsel %vm292_vm3, %v4734_v34, %v4736_v39 }
 0x3a8   : > { %v4744_v43 = vsel %vm299_vm4, %v4738_v42, 0  ;;  %v5693_v21 = vpop.permute.xlu0 %5692 }
 0x3a9   : > { %v4746_v44 = vand.u32 4294901760, %v4744_v43  ;;  %v4832_v47 = vand.u32 4294901760, %v4831_v41 }
 0x3aa   : > { %v4719_v54 = vpop.permute.xlu1 %4718 }
 0x3ab   : > { %v4825_v48 = vsub.f32 %v4744_v43, %v4746_v44  ;;  %4747 = vmatprep.subr.mxu1 %v4746_v44  ;;  %v4833_v50 = vsub.f32 %v4831_v41, %v4832_v47  ;;  %v4723_v56 = vsel %vm276_vm5, %v4719_v54, %v4721_v55 }
 0x3ac   : > { %4749 = vmatpush1.msra.mxu1 %v4748_v37  ;;  %v4727_v57 = vsel %vm9727_vm6, %v4723_v56, 0.0  ;;  %v5691_v25 = vpop.permute.xlu0 %5690  ;;  %v9234_v56 = vld [vmem:[%s10211_s3 + $0xc] sm:$0xf] }
 0x3ad   : > { %4818 = vmatmul.mubr.f32.vlgmr.msra.gmra.mrb[0].mxu1 %v4817_v45  ;;  %v4826_v49 = vand.u32 4294901760, %v4825_v48  ;;  %v4834_v53 = vand.u32 4294901760, %v4833_v50  ;;  %v5218_v59 = vsel %vm299_vm4, %v4727_v57, 0  ;;  %v5696_v27 = vsel %vm1258_vm8, %v5691_v25, %v5693_v21 }
 0x3ae   : > { %4898 = vmatprep.mubr.f32.mxu1 %v9576_v0  ;;  %v4717_v58 = vpop.permute.xlu1 %4716  ;;  %v5220_v62 = vand.u32 4294901760, %v5218_v59 }
 0x3af   : > { %v4827_v51 = vsub.f32 %v4825_v48, %v4826_v49  ;;  %v4722_v60 = vsel %vm276_vm5, %v4717_v58, %v4719_v54 }
 0x3b0   : > { %v4726_v63 = vsel %vm9740_vm7, %v4722_v60, 0.0  ;;  %v5299_v3 = vsub.f32 %v5218_v59, %v5220_v62  ;;  %v6190_v50 = vpop.permute.xlu0 %6189  ;;  %v6200_v59 = vsel %vm295_vm1, %v9234_v56, 0 }
 0x3b1   : > { %v4828_v52 = vand.u32 4294901760, %v4827_v51  ;;  %v5215_v4 = vsel %vm299_vm4, %v4726_v63, 0 }
 0x3b2   : > { %v5222_v6 = vand.u32 4294901760, %v5215_v4  ;;  %v5300_v7 = vand.u32 4294901760, %v5299_v3  ;;  %v5695_v2 = vpop.permute.xlu1 %5694 }
 0x3b3   : > { %4829 = vmatprep.subr.mxu1 %v4828_v52  ;;  %v5697_v23 = vsel %vm1258_vm8, %v5693_v21, %v5695_v2 }
 0x3b4   : > { %4835 = vmatpush1.msra.mxu1 %v4834_v53  ;;  %v5305_v11 = vsub.f32 %v5215_v4, %v5222_v6  ;;  %v5301_v12 = vsub.f32 %v5299_v3, %v5300_v7  ;;  %v5701_v24 = vsel %vm9780_vm9, %v5697_v23, 0.0 }
 0x3b5   : > { %4900 = vmatmul.mubr.f32.vlgmr.msra.gmra.mrb[0].mxu1 %v10009_v30  ;;  %4908 = vmatprep.subr.mxu1 %v4825_v48  ;;  %v5711_v26 = vsel %vm299_vm4, %v5701_v24, 0 }
 0x3b6   : > { %4911 = vmatpush1.msra.mxu1 %v4831_v41  ;;  %4974 = vmatprep.mubr.f32.mxu1 %v9576_v0  ;;  %v5306_v13 = vand.u32 4294901760, %v5305_v11  ;;  %v5302_v15 = vand.u32 4294901760, %v5301_v12  ;;  %v5713_v29 = vand.u32 4294901760, %v5711_v26 }
 0x3b7   : > { %4984 = vmatprep.subr.mxu1 %v4746_v44 }
 0x3b8   : > { %v5307_v18 = vsub.f32 %v5305_v11, %v5306_v13  ;;  %v5792_v33 = vsub.f32 %v5711_v26, %v5713_v29 }
 0x3ba   : > { %v5308_v20 = vand.u32 4294901760, %v5307_v18  ;;  %v5793_v36 = vand.u32 4294901760, %v5792_v33 }
 0x3bc   : > { %v5794_v39 = vsub.f32 %v5792_v33, %v5793_v36 }
 0x3bd   : > { %4977 = vmatmul.mubr.f32.vlgmr.msra.gmra.mrb[0].mxu1 %v4814_v31  ;;  %v5705_v31 = vsel %vm295_vm1, %v9233_v28, 0 }
 0x3be   : > { %4986 = vmatpush1.msra.mxu1 %v4748_v37  ;;  %5049 = vmatprep.mubr.f32.mxu1 %v9576_v0  ;;  %v5780_v34 = vand.u32 4294901760, %v5705_v31  ;;  %v5795_v43 = vand.u32 4294901760, %v5794_v39 }
 0x3bf   : > { %5062 = vmatprep.subr.mxu1 %v4826_v49  ;;  %v6188_v49 = vpop.permute.xlu1 %6187 }
 0x3c0   : > { %v6192_v51 = vsel %vm1754_vm11, %v6188_v49, %v6190_v50 }
 0x3c1   : > { %v6196_v52 = vsel %vm9727_vm6, %v6192_v51, 0.0 }
 0x3c2   : > { %v6206_v54 = vsel %vm299_vm4, %v6196_v52, 0 }
 0x3c3   : > { %v6186_v53 = vpop.permute.xlu1 %6185  ;;  %v6208_v57 = vand.u32 4294901760, %v6206_v54 }
 0x3c4   : > { %v6191_v55 = vsel %vm1754_vm11, %v6186_v53, %v6188_v49 }
 0x3c5   : > { %5053 = vmatmul.mubr.f32.vlgmr.msra.gmra.mrb[0].mxu1 %v4815_v32  ;;  %v6195_v58 = vsel %vm9740_vm7, %v6191_v55, 0.0  ;;  %v6287_v60 = vsub.f32 %v6206_v54, %v6208_v57 }
 0x3c6   : > { %5066 = vmatpush1.msra.mxu1 %v4832_v47  ;;  %5129 = vmatprep.mubr.f32.mxu1 %v9576_v0  ;;  %v6203_v61 = vsel %vm299_vm4, %v6195_v58, 0 }
 0x3c7   : > { %5138 = vmatprep.subr.mxu1 %v4746_v44  ;;  %v6210_v63 = vand.u32 4294901760, %v6203_v61  ;;  %v6288_v1 = vand.u32 4294901760, %v6287_v60 }
 0x3c9   : > { %v6293_v4 = vsub.f32 %v6203_v61, %v6210_v63 }
 0x3cd   : > { %5131 = vmatmul.mubr.f32.vlgmr.msra.gmra.mrb[0].mxu1 %v10009_v30 }
 0x3ce   : > { %5140 = vmatpush1.msra.mxu1 %v4748_v37  ;;  %5203 = vmatprep.mubr.f32.mxu1 %v9576_v0  ;;  %v5781_v37 = vsub.f32 %v5705_v31, %v5780_v34 }
 0x3cf   : > { %5221 = vmatprep.subr.mxu1 %v5220_v62 }
 0x3d0   : > { %v5782_v41 = vand.u32 4294901760, %v5781_v37 }
 0x3d2   : > { %v5783_v44 = vsub.f32 %v5781_v37, %v5782_v41 }
 0x3d4   : > { %v5784_v47 = vand.u32 4294901760, %v5783_v44 }
 0x3d5   : > { %5205 = vmatmul.mubr.f32.vlgmr.msra.gmra.mrb[0].mxu1 %v10009_v30  ;;  %v5700_v30 = vsel %vm9792_vm10, %v5696_v27, 0.0 }
 0x3d6   : > { %5223 = vmatpush1.msra.mxu1 %v5222_v6  ;;  %5286 = vmatprep.mubr.f32.mxu1 %v9576_v0  ;;  %v5708_v32 = vsel %vm299_vm4, %v5700_v30, 0 }
 0x3d7   : > { %5303 = vmatprep.subr.mxu1 %v5302_v15  ;;  %v5715_v35 = vand.u32 4294901760, %v5708_v32  ;;  %v6685_v15 = vsel %vm299_vm4, %v9978_v22, 0 }
 0x3d8   : > { %v6687_v18 = vand.u32 4294901760, %v6685_v15 }
 0x3d9   : > { %v5798_v38 = vsub.f32 %v5708_v32, %v5715_v35 }
 0x3da   : > { %v6766_v2 = vsub.f32 %v6685_v15, %v6687_v18 }
 0x3db   : > { %v5799_v42 = vand.u32 4294901760, %v5798_v38 }
 0x3dc   : > { %v6767_v22 = vand.u32 4294901760, %v6766_v2 }
 0x3dd   : > { %5292 = vmatmul.mubr.f32.vlgmr.msra.gmra.mrb[0].mxu1 %v5291_v19  ;;  %v5800_v45 = vsub.f32 %v5798_v38, %v5799_v42  ;;  %v6681_v19 = vsel %vm295_vm1, %v9235_v16, 0 }
 0x3de   : > { %5309 = vmatpush1.msra.mxu1 %v5308_v20  ;;  %5372 = vmatprep.mubr.f32.mxu1 %v9576_v0  ;;  %v6683_v20 = vsel %vm299_vm4, %v9965_v17, 0  ;;  %v6754_v21 = vand.u32 4294901760, %v6681_v19  ;;  %v6768_v26 = vsub.f32 %v6766_v2, %v6767_v22 }
 0x3df   : > { %5382 = vmatprep.subr.mxu1 %v5299_v3  ;;  %v5801_v48 = vand.u32 4294901760, %v5800_v45  ;;  %v6689_v23 = vand.u32 4294901760, %v6683_v20 }
 0x3e0   : > { %v6755_v24 = vsub.f32 %v6681_v19, %v6754_v21 }
 0x3e1   : > { %v6772_v25 = vsub.f32 %v6683_v20, %v6689_v23 }
 0x3e2   : > { %v6756_v27 = vand.u32 4294901760, %v6755_v24 }
 0x3e3   : > { %v6773_v28 = vand.u32 4294901760, %v6772_v25 }
 0x3e4   : > { %v6757_v30 = vsub.f32 %v6755_v24, %v6756_v27 }
 0x3e5   : > { %5374 = vmatmul.mubr.f32.vlgmr.msra.gmra.mrb[0].mxu1 %v5287_v5  ;;  %v6774_v17 = vsub.f32 %v6772_v25, %v6773_v28 }
 0x3e6   : > { %5385 = vmatpush1.msra.mxu1 %v5305_v11  ;;  %5448 = vmatprep.mubr.f32.mxu1 %v9576_v0  ;;  %v6758_v31 = vand.u32 4294901760, %v6757_v30  ;;  %v9238_v30 = vld [vmem:[%s10211_s3 + $0x1c] sm:$0xf] }
 0x3e7   : > { %5458 = vmatprep.subr.mxu1 %v5220_v62  ;;  %v6775_v32 = vand.u32 4294901760, %v6774_v17 }
 0x3ed   : > { %5451 = vmatmul.mubr.f32.vlgmr.msra.gmra.mrb[0].mxu1 %v5288_v9 }
 0x3ee   : > { %5460 = vmatpush1.msra.mxu1 %v5222_v6  ;;  %5523 = vmatprep.mubr.f32.mxu1 %v9576_v0 }
 0x3ef   : > { %5536 = vmatprep.subr.mxu1 %v5300_v7  ;;  %v6294_v7 = vand.u32 4294901760, %v6293_v4 }
 0x3f1   : > { %v6295_v12 = vsub.f32 %v6293_v4, %v6294_v7 }
 0x3f5   : > { %5527 = vmatmul.mubr.f32.vlgmr.msra.gmra.mrb[0].mxu1 %v5289_v10 }
 0x3f6   : > { %5540 = vmatpush1.msra.mxu1 %v5306_v13  ;;  %5603 = vmatprep.mubr.f32.mxu1 %v9576_v0  ;;  %v6296_v13 = vand.u32 4294901760, %v6295_v12 }
 0x3f7   : > { %5612 = vmatprep.subr.mxu1 %v5220_v62  ;;  %v6275_v62 = vand.u32 4294901760, %v6200_v59 }
 0x3f9   : > { %v6276_v3 = vsub.f32 %v6200_v59, %v6275_v62 }
 0x3fd   : > { %5605 = vmatmul.mubr.f32.vlgmr.msra.gmra.mrb[0].mxu1 %v5287_v5 }
 0x3fe   : > { %5614 = vmatpush1.msra.mxu1 %v5222_v6  ;;  %5677 = vmatprep.mubr.f32.mxu1 %v9576_v0  ;;  %v6277_v6 = vand.u32 4294901760, %v6276_v3 }
 0x3ff   : > { %5714 = vmatprep.subr.mxu1 %v5713_v29 }
 0x400   : > { %v6278_v11 = vsub.f32 %v6276_v3, %v6277_v6 }
 0x402   : > { %v6279_v10 = vand.u32 4294901760, %v6278_v11 }
 0x405   : > { %5679 = vmatmul.mubr.f32.vlgmr.msra.gmra.mrb[0].mxu1 %v5287_v5  ;;  %v6289_v5 = vsub.f32 %v6287_v60, %v6288_v1 }
 0x406   : > { %5716 = vmatpush1.msra.mxu1 %v5715_v35  ;;  %5779 = vmatprep.mubr.f32.mxu1 %v9576_v0 }
 0x407   : > { %5796 = vmatprep.subr.mxu1 %v5795_v43  ;;  %v6290_v9 = vand.u32 4294901760, %v6289_v5 }
 0x40d   : > { %5785 = vmatmul.mubr.f32.vlgmr.msra.gmra.mrb[0].mxu1 %v5784_v47 }
 0x40e   : > { %5802 = vmatpush1.msra.mxu1 %v5801_v48  ;;  %5865 = vmatprep.mubr.f32.mxu1 %v9576_v0 }
 0x40f   : > { %5875 = vmatprep.subr.mxu1 %v5792_v33  ;;  %v7164_v33 = vpop.permute.xlu1 %7163 }
 0x413   : > { %v7657_v61 = vpop.permute.xlu1 %7656 }
 0x415   : > { %5867 = vmatmul.mubr.f32.vlgmr.msra.gmra.mrb[0].mxu1 %v5780_v34 }
 0x416   : > { %5878 = vmatpush1.msra.mxu1 %v5798_v38  ;;  %5941 = vmatprep.mubr.f32.mxu1 %v9576_v0 }
 0x417   : > { %5951 = vmatprep.subr.mxu1 %v5713_v29 }
 0x41d   : > { %5944 = vmatmul.mubr.f32.vlgmr.msra.gmra.mrb[0].mxu1 %v5781_v37 }
 0x41e   : > { %5953 = vmatpush1.msra.mxu1 %v5715_v35  ;;  %6016 = vmatprep.mubr.f32.mxu1 %v9576_v0 }
 0x41f   : > { %6029 = vmatprep.subr.mxu1 %v5793_v36 }
 0x425   : > { %6020 = vmatmul.mubr.f32.vlgmr.msra.gmra.mrb[0].mxu1 %v5782_v41  ;;  %v9236_v41 = vld [vmem:[%s10211_s3 + $0x14] sm:$0xf] }
 0x426   : > { %6033 = vmatpush1.msra.mxu1 %v5799_v42  ;;  %6096 = vmatprep.mubr.f32.mxu1 %v9576_v0  ;;  %v7174_v44 = vsel %vm295_vm1, %v9236_v41, 0 }
 0x427   : > { %6105 = vmatprep.subr.mxu1 %v5713_v29  ;;  %v6769_v29 = vand.u32 4294901760, %v6768_v26  ;;  %v7249_v48 = vand.u32 4294901760, %v7174_v44 }
 0x429   : > { %v7250_v51 = vsub.f32 %v7174_v44, %v7249_v48 }
 0x42b   : > { %v7251_v54 = vand.u32 4294901760, %v7250_v51 }
 0x42d   : > { %6098 = vmatmul.mubr.f32.vlgmr.msra.gmra.mrb[0].mxu1 %v5780_v34 }
 0x42e   : > { %6107 = vmatpush1.msra.mxu1 %v5715_v35  ;;  %6170 = vmatprep.mubr.f32.mxu1 %v9576_v0 }
 0x42f   : > { %6209 = vmatprep.subr.mxu1 %v6208_v57 }
 0x435   : > { %6172 = vmatmul.mubr.f32.vlgmr.msra.gmra.mrb[0].mxu1 %v5780_v34  ;;  %v7162_v34 = vpop.permute.xlu0 %7161 }
 0x436   : > { %6211 = vmatpush1.msra.mxu1 %v6210_v63  ;;  %6274 = vmatprep.mubr.f32.mxu1 %v9576_v0  ;;  %v7166_v35 = vsel %vm2729_vm12, %v7162_v34, %v7164_v33 }
 0x437   : > { %6291 = vmatprep.subr.mxu1 %v6290_v9  ;;  %v7170_v36 = vsel %vm9780_vm9, %v7166_v35, 0.0 }
 0x438   : > { %v7180_v38 = vsel %vm299_vm4, %v7170_v36, 0 }
 0x439   : > { %v7160_v37 = vpop.permute.xlu0 %7159  ;;  %v7182_v42 = vand.u32 4294901760, %v7180_v38 }
 0x43a   : > { %v7165_v39 = vsel %vm2729_vm12, %v7160_v37, %v7162_v34 }
 0x43b   : > { %v7169_v43 = vsel %vm9792_vm10, %v7165_v39, 0.0  ;;  %v7261_v47 = vsub.f32 %v7180_v38, %v7182_v42 }
 0x43c   : > { %v7177_v45 = vsel %vm299_vm4, %v7169_v43, 0 }
 0x43d   : > { %6280 = vmatmul.mubr.f32.vlgmr.msra.gmra.mrb[0].mxu1 %v6279_v10  ;;  %v7184_v49 = vand.u32 4294901760, %v7177_v45  ;;  %v7262_v50 = vand.u32 4294901760, %v7261_v47 }
 0x43e   : > { %6297 = vmatpush1.msra.mxu1 %v6296_v13  ;;  %6360 = vmatprep.mubr.f32.mxu1 %v9576_v0 }
 0x43f   : > { %6370 = vmatprep.subr.mxu1 %v6287_v60  ;;  %v7267_v52 = vsub.f32 %v7177_v45, %v7184_v49  ;;  %v7263_v53 = vsub.f32 %v7261_v47, %v7262_v50 }
 0x441   : > { %v7268_v55 = vand.u32 4294901760, %v7267_v52  ;;  %v7264_v56 = vand.u32 4294901760, %v7263_v53 }
 0x443   : > { %v7269_v58 = vsub.f32 %v7267_v52, %v7268_v55 }
 0x445   : > { %6362 = vmatmul.mubr.f32.vlgmr.msra.gmra.mrb[0].mxu1 %v6275_v62  ;;  %v7270_v60 = vand.u32 4294901760, %v7269_v58 }
 0x446   : > { %6373 = vmatpush1.msra.mxu1 %v6293_v4  ;;  %6436 = vmatprep.mubr.f32.mxu1 %v9576_v0 }
 0x447   : > { %6446 = vmatprep.subr.mxu1 %v6208_v57 }
 0x44d   : > { %6439 = vmatmul.mubr.f32.vlgmr.msra.gmra.mrb[0].mxu1 %v6276_v3  ;;  %v7655_v3 = vpop.permute.xlu1 %7654 }
 0x44e   : > { %6448 = vmatpush1.msra.mxu1 %v6210_v63  ;;  %6511 = vmatprep.mubr.f32.mxu1 %v9576_v0  ;;  %v7660_v5 = vsel %vm3225_vm13, %v7655_v3, %v7657_v61 }
 0x44f   : > { %6524 = vmatprep.subr.mxu1 %v6288_v1  ;;  %v7664_v9 = vsel %vm9740_vm7, %v7660_v5, 0.0 }
 0x450   : > { %v7672_v12 = vsel %vm299_vm4, %v7664_v9, 0 }
 0x451   : > { %v7679_v13 = vand.u32 4294901760, %v7672_v12 }
 0x453   : > { %v7762_v46 = vsub.f32 %v7672_v12, %v7679_v13 }
 0x455   : > { %6515 = vmatmul.mubr.f32.vlgmr.msra.gmra.mrb[0].mxu1 %v6277_v6  ;;  %v9237_v6 = vld [vmem:[%s10211_s3 + $0x18] sm:$0xf]  ;;  %v7763_v20 = vand.u32 4294901760, %v7762_v46 }
 0x456   : > { %6528 = vmatpush1.msra.mxu1 %v6294_v7  ;;  %6591 = vmatprep.mubr.f32.mxu1 %v9576_v0  ;;  %v7669_v40 = vsel %vm295_vm1, %v9237_v6, 0 }
 0x457   : > { %6600 = vmatprep.subr.mxu1 %v6208_v57  ;;  %v7252_v57 = vsub.f32 %v7250_v51, %v7251_v54  ;;  %v7744_v10 = vand.u32 4294901760, %v7669_v40 }
 0x459   : > { %v7253_v59 = vand.u32 4294901760, %v7252_v57  ;;  %v7745_v16 = vsub.f32 %v7669_v40, %v7744_v10  ;;  %v9239_v57 = vld [vmem:[%s10211_s3 + $0x20] sm:$0xf] }
 0x45a   : > { %v8653_v8 = vsel %vm295_vm1, %v9239_v57, 0 }
 0x45b   : > { %v7746_v19 = vand.u32 4294901760, %v7745_v16 }
 0x45d   : > { %6593 = vmatmul.mubr.f32.vlgmr.msra.gmra.mrb[0].mxu1 %v6275_v62 }
 0x45e   : > { %6602 = vmatpush1.msra.mxu1 %v6210_v63  ;;  %6665 = vmatprep.mubr.f32.mxu1 %v9576_v0 }
 0x45f   : > { %6688 = vmatprep.subr.mxu1 %v6687_v18 }
 0x465   : > { %6667 = vmatmul.mubr.f32.vlgmr.msra.gmra.mrb[0].mxu1 %v6275_v62  ;;  %v7659_v62 = vpop.permute.xlu0 %7658 }
 0x466   : > { %6690 = vmatpush1.msra.mxu1 %v6689_v23  ;;  %6753 = vmatprep.mubr.f32.mxu1 %v9576_v0  ;;  %v7661_v63 = vsel %vm3225_vm13, %v7657_v61, %v7659_v62  ;;  %v8728_v62 = vand.u32 4294901760, %v8653_v8 }
 0x467   : > { %6770 = vmatprep.subr.mxu1 %v6769_v29  ;;  %v7665_v1 = vsel %vm9727_vm6, %v7661_v63, 0.0 }
 0x468   : > { %v7675_v4 = vsel %vm299_vm4, %v7665_v1, 0  ;;  %v8729_v3 = vsub.f32 %v8653_v8, %v8728_v62 }
 0x469   : > { %v7677_v7 = vand.u32 4294901760, %v7675_v4  ;;  %v8154_v26 = vpop.permute.xlu0 %8153 }
 0x46a   : > { %v8730_v5 = vand.u32 4294901760, %v8729_v3 }
 0x46b   : > { %v7756_v11 = vsub.f32 %v7675_v4, %v7677_v7 }
 0x46c   : > { %v8731_v9 = vsub.f32 %v8729_v3, %v8730_v5 }
 0x46d   : > { %6759 = vmatmul.mubr.f32.vlgmr.msra.gmra.mrb[0].mxu1 %v6758_v31  ;;  %v7757_v15 = vand.u32 4294901760, %v7756_v11  ;;  %v8152_v29 = vpop.permute.xlu0 %8151 }
 0x46e   : > { %6776 = vmatpush1.msra.mxu1 %v6775_v32  ;;  %6839 = vmatprep.mubr.f32.mxu1 %v9576_v0  ;;  %v8157_v31 = vsel %vm3723_vm14, %v8152_v29, %v8154_v26  ;;  %v8160_v32 = vsel %vm295_vm1, %v9238_v30, 0 }
 0x46f   : > { %6849 = vmatprep.subr.mxu1 %v6766_v2  ;;  %v8162_v33 = vsel %vm299_vm4, %v8157_v31, 0  ;;  %v8233_v35 = vand.u32 4294901760, %v8160_v32 }
 0x470   : > { %v8168_v36 = vand.u32 4294901760, %v8162_v33 }
 0x471   : > { %v8234_v38 = vsub.f32 %v8160_v32, %v8233_v35 }
 0x472   : > { %v8251_v39 = vsub.f32 %v8162_v33, %v8168_v36 }
 0x474   : > { %v8252_v43 = vand.u32 4294901760, %v8251_v39 }
 0x475   : > { %6841 = vmatmul.mubr.f32.vlgmr.msra.gmra.mrb[0].mxu1 %v6754_v21 }
 0x476   : > { %6852 = vmatpush1.msra.mxu1 %v6772_v25  ;;  %6915 = vmatprep.mubr.f32.mxu1 %v9576_v0  ;;  %v8156_v25 = vpop.permute.xlu1 %8155 }
 0x477   : > { %6925 = vmatprep.subr.mxu1 %v6687_v18 }
 0x47d   : > { %6918 = vmatmul.mubr.f32.vlgmr.msra.gmra.mrb[0].mxu1 %v6755_v24 }
 0x47e   : > { %6927 = vmatpush1.msra.mxu1 %v6689_v23  ;;  %6990 = vmatprep.mubr.f32.mxu1 %v9576_v0 }
 0x47f   : > { %7003 = vmatprep.subr.mxu1 %v6767_v22 }
 0x485   : > { %6994 = vmatmul.mubr.f32.vlgmr.msra.gmra.mrb[0].mxu1 %v6756_v27  ;;  %v8158_v27 = vsel %vm3723_vm14, %v8154_v26, %v8156_v25 }
 0x486   : > { %7007 = vmatpush1.msra.mxu1 %v6773_v28  ;;  %7070 = vmatprep.mubr.f32.mxu1 %v9576_v0  ;;  %v8164_v28 = vsel %vm299_vm4, %v8158_v27, 0 }
 0x487   : > { %7079 = vmatprep.subr.mxu1 %v6687_v18  ;;  %v7758_v18 = vsub.f32 %v7756_v11, %v7757_v15  ;;  %v8166_v17 = vand.u32 4294901760, %v8164_v28 }
 0x489   : > { %v7759_v2 = vand.u32 4294901760, %v7758_v18  ;;  %v8245_v34 = vsub.f32 %v8164_v28, %v8166_v17  ;;  %v9136_v18 = vld [vmem:[%s9673_s9] sm:$0xff]  ;;  %s9516_s9 = sshll.u32 %s9586_s22, 4  ;;  %s9517_s9 = int_to_ptr.vmem [resolvable:$false] %s9516_s9 }
 0x48a   : > { %s9518_s10 = scalar_lea.vmem %s9517_s9, 256  ;;  %p9519_p0 = scmp.lt.s32.totalorder %s10168_s8, %s9517_s9 }
 0x48b   : > { %v8246_v37 = vand.u32 4294901760, %v8245_v34  ;;  %p9520_p1 = scmp.lt.s32.totalorder %s9518_s10, %s9512_s30 }
 0x48d   : > { %7072 = vmatmul.mubr.f32.vlgmr.msra.gmra.mrb[0].mxu1 %v6754_v21  ;;  %v8247_v41 = vsub.f32 %v8245_v34, %v8246_v37  ;;  %p9521_p2 = por %p9520_p1, %p9519_p0 }
 0x48e   : > { %7081 = vmatpush1.msra.mxu1 %v6689_v23  ;;  %7144 = vmatprep.mubr.f32.mxu1 %v9576_v0  ;;  %v7764_v23 = vsub.f32 %v7762_v46, %v7763_v20 }
 0x48f   : > { %7183 = vmatprep.subr.mxu1 %v7182_v42  ;;  %v8248_v44 = vand.u32 4294901760, %v8247_v41  ;;  %p9522_p3 = pnand %p9521_p2, %p9515_p13 }
 0x490   : > { %v7765_v24 = vand.u32 4294901760, %v7764_v23 }
 0x495   : > { %7146 = vmatmul.mubr.f32.vlgmr.msra.gmra.mrb[0].mxu1 %v6754_v21  ;;  %v7747_v21 = vsub.f32 %v7745_v16, %v7746_v19 }
 0x496   : > { %7185 = vmatpush1.msra.mxu1 %v7184_v49  ;;  %7248 = vmatprep.mubr.f32.mxu1 %v9576_v0 }
 0x497   : > { %7265 = vmatprep.subr.mxu1 %v7264_v56  ;;  %v7748_v22 = vand.u32 4294901760, %v7747_v21 }
 0x49d   : > { %7254 = vmatmul.mubr.f32.vlgmr.msra.gmra.mrb[0].mxu1 %v7253_v59 }
 0x49e   : > { %7271 = vmatpush1.msra.mxu1 %v7270_v60  ;;  %7334 = vmatprep.mubr.f32.mxu1 %v9576_v0 }
 0x49f   : > { %7344 = vmatprep.subr.mxu1 %v7261_v47  ;;  %v8253_v47 = vsub.f32 %v8251_v39, %v8252_v43 }
 0x4a5   : > { %7336 = vmatmul.mubr.f32.vlgmr.msra.gmra.mrb[0].mxu1 %v7249_v48 }
 0x4a6   : > { %7347 = vmatpush1.msra.mxu1 %v7267_v52  ;;  %7410 = vmatprep.mubr.f32.mxu1 %v9576_v0 }
 0x4a7   : > { %7420 = vmatprep.subr.mxu1 %v7182_v42 }
 0x4ad   : > { %7413 = vmatmul.mubr.f32.vlgmr.msra.gmra.mrb[0].mxu1 %v7250_v51  ;;  %v8641_v51 = vpop.permute.xlu1 %8640 }
 0x4ae   : > { %7422 = vmatpush1.msra.mxu1 %v7184_v49  ;;  %7485 = vmatprep.mubr.f32.mxu1 %v9576_v0 }
 0x4af   : > { %7498 = vmatprep.subr.mxu1 %v7262_v50  ;;  %v8643_v50 = vpop.permute.xlu0 %8642 }
 0x4b0   : > { %v8645_v52 = vsel %vm4211_vm15, %v8641_v51, %v8643_v50 }
 0x4b1   : > { %v8649_v53 = vsel %vm9780_vm9, %v8645_v52, 0.0 }
 0x4b5   : > { %7489 = vmatmul.mubr.f32.vlgmr.msra.gmra.mrb[0].mxu1 %v7251_v54  ;;  %v8639_v54 = vpop.permute.xlu1 %8638 }
 0x4b6   : > { %7502 = vmatpush1.msra.mxu1 %v7268_v55  ;;  %7565 = vmatprep.mubr.f32.mxu1 %v9576_v0  ;;  %v8659_v55 = vsel %vm299_vm4, %v8649_v53, 0  ;;  %v8644_v56 = vsel %vm4211_vm15, %v8639_v54, %v8641_v51 }
 0x4b7   : > { %7574 = vmatprep.subr.mxu1 %v7182_v42  ;;  %v8235_v42 = vand.u32 4294901760, %v8234_v38  ;;  %v8661_v58 = vand.u32 4294901760, %v8659_v55  ;;  %v8648_v59 = vsel %vm9792_vm10, %v8644_v56, 0.0 }
 0x4b8   : > { %v8656_v61 = vsel %vm299_vm4, %v8648_v59, 0 }
 0x4b9   : > { %v8236_v45 = vsub.f32 %v8234_v38, %v8235_v42  ;;  %v8740_v60 = vsub.f32 %v8659_v55, %v8661_v58  ;;  %v8663_v63 = vand.u32 4294901760, %v8656_v61 }
 0x4bb   : > { %v8741_v1 = vand.u32 4294901760, %v8740_v60  ;;  %v8746_v14 = vsub.f32 %v8656_v61, %v8663_v63 }
 0x4bd   : > { %7567 = vmatmul.mubr.f32.vlgmr.msra.gmra.mrb[0].mxu1 %v7249_v48  ;;  %v8742_v4 = vsub.f32 %v8740_v60, %v8741_v1  ;;  %v8747_v6 = vand.u32 4294901760, %v8746_v14 }
 0x4be   : > { %7576 = vmatpush1.msra.mxu1 %v7184_v49  ;;  %7639 = vmatprep.mubr.f32.mxu1 %v9576_v0  ;;  %v8254_v49 = vand.u32 4294901760, %v8253_v47 }
 0x4bf   : > { %7678 = vmatprep.subr.mxu1 %v7677_v7  ;;  %v8748_v40 = vsub.f32 %v8746_v14, %v8747_v6 }
 0x4c1   : > { %v8749_v12 = vand.u32 4294901760, %v8748_v40 }
 0x4c5   : > { %7641 = vmatmul.mubr.f32.vlgmr.msra.gmra.mrb[0].mxu1 %v7249_v48  ;;  %v8237_v48 = vand.u32 4294901760, %v8236_v45 }
 0x4c6   : > { %7680 = vmatpush1.msra.mxu1 %v7679_v13  ;;  %7743 = vmatprep.mubr.f32.mxu1 %v9576_v0 }
 0x4c7   : > { %7760 = vmatprep.subr.mxu1 %v7759_v2 }
 0x4cd   : > { %7749 = vmatmul.mubr.f32.vlgmr.msra.gmra.mrb[0].mxu1 %v7748_v22 }
 0x4ce   : > { %7766 = vmatpush1.msra.mxu1 %v7765_v24  ;;  %7829 = vmatprep.mubr.f32.mxu1 %v9576_v0 }
 0x4cf   : > { %7839 = vmatprep.subr.mxu1 %v7756_v11  ;;  %v8732_v11 = vand.u32 4294901760, %v8731_v9 }
 0x4d5   : > { %7831 = vmatmul.mubr.f32.vlgmr.msra.gmra.mrb[0].mxu1 %v7744_v10 }
 0x4d6   : > { %7842 = vmatpush1.msra.mxu1 %v7762_v46  ;;  %7905 = vmatprep.mubr.f32.mxu1 %v9576_v0 }
 0x4d7   : > { %7915 = vmatprep.subr.mxu1 %v7677_v7 }
 0x4dd   : > { %7908 = vmatmul.mubr.f32.vlgmr.msra.gmra.mrb[0].mxu1 %v7745_v16 }
 0x4de   : > { %7917 = vmatpush1.msra.mxu1 %v7679_v13  ;;  %7980 = vmatprep.mubr.f32.mxu1 %v9576_v0 }
 0x4df   : > { %7993 = vmatprep.subr.mxu1 %v7757_v15 }
 0x4e5   : > { %7984 = vmatmul.mubr.f32.vlgmr.msra.gmra.mrb[0].mxu1 %v7746_v19 }
 0x4e6   : > { %7997 = vmatpush1.msra.mxu1 %v7763_v20  ;;  %8060 = vmatprep.mubr.f32.mxu1 %v9576_v0 }
 0x4e7   : > { %8069 = vmatprep.subr.mxu1 %v7677_v7  ;;  %v8743_v7 = vand.u32 4294901760, %v8742_v4 }
 0x4ed   : > { %8062 = vmatmul.mubr.f32.vlgmr.msra.gmra.mrb[0].mxu1 %v7744_v10 }
 0x4ee   : > { %8071 = vmatpush1.msra.mxu1 %v7679_v13  ;;  %8134 = vmatprep.mubr.f32.mxu1 %v9576_v0 }
 0x4ef   : > { %8167 = vmatprep.subr.mxu1 %v8166_v17 }
 0x4f5   : > { %8136 = vmatmul.mubr.f32.vlgmr.msra.gmra.mrb[0].mxu1 %v7744_v10  ;;  %v9132_v10 = vpop.permute.xlu0 %9131 }
 0x4f6   : > { %8169 = vmatpush1.msra.mxu1 %v8168_v36  ;;  %8232 = vmatprep.mubr.f32.mxu1 %v9576_v0 }
 0x4f7   : > { %8249 = vmatprep.subr.mxu1 %v8248_v44 }
 0x4fd   : > { %8238 = vmatmul.mubr.f32.vlgmr.msra.gmra.mrb[0].mxu1 %v8237_v48 }
 0x4fe   : > { %8255 = vmatpush1.msra.mxu1 %v8254_v49  ;;  %8318 = vmatprep.mubr.f32.mxu1 %v9576_v0 }
 0x4ff   : > { %8328 = vmatprep.subr.mxu1 %v8245_v34 }
 0x505   : > { %8320 = vmatmul.mubr.f32.vlgmr.msra.gmra.mrb[0].mxu1 %v8233_v35 }
 0x506   : > { %8331 = vmatpush1.msra.mxu1 %v8251_v39  ;;  %8394 = vmatprep.mubr.f32.mxu1 %v9576_v0 }
 0x507   : > { %8404 = vmatprep.subr.mxu1 %v8166_v17 }
 0x50d   : > { %8397 = vmatmul.mubr.f32.vlgmr.msra.gmra.mrb[0].mxu1 %v8234_v38 }
 0x50e   : > { %8406 = vmatpush1.msra.mxu1 %v8168_v36  ;;  %8469 = vmatprep.mubr.f32.mxu1 %v9576_v0 }
 0x50f   : > { %8482 = vmatprep.subr.mxu1 %v8246_v37 }
 0x515   : > { %8473 = vmatmul.mubr.f32.vlgmr.msra.gmra.mrb[0].mxu1 %v8235_v42 }
 0x516   : > { %8486 = vmatpush1.msra.mxu1 %v8252_v43  ;;  %8549 = vmatprep.mubr.f32.mxu1 %v9576_v0 }
 0x517   : > { %8558 = vmatprep.subr.mxu1 %v8166_v17 }
 0x51d   : > { %8551 = vmatmul.mubr.f32.vlgmr.msra.gmra.mrb[0].mxu1 %v8233_v35 }
 0x51e   : > { %8560 = vmatpush1.msra.mxu1 %v8168_v36  ;;  %8623 = vmatprep.mubr.f32.mxu1 %v9576_v0 }
 0x51f   : > { %8662 = vmatprep.subr.mxu1 %v8661_v58 }
 0x525   : > { %8625 = vmatmul.mubr.f32.vlgmr.msra.gmra.mrb[0].mxu1 %v8233_v35 }
 0x526   : > { %8664 = vmatpush1.msra.mxu1 %v8663_v63  ;;  %8727 = vmatprep.mubr.f32.mxu1 %v9576_v0 }
 0x527   : > { %8744 = vmatprep.subr.mxu1 %v8743_v7 }
 0x52d   : > { %8733 = vmatmul.mubr.f32.vlgmr.msra.gmra.mrb[0].mxu1 %v8732_v11 }
 0x52e   : > { %8750 = vmatpush1.msra.mxu1 %v8749_v12  ;;  %8813 = vmatprep.mubr.f32.mxu1 %v9576_v0 }
 0x52f   : > { %8823 = vmatprep.subr.mxu1 %v8740_v60 }
 0x535   : > { %8815 = vmatmul.mubr.f32.vlgmr.msra.gmra.mrb[0].mxu1 %v8728_v62 }
 0x536   : > { %8826 = vmatpush1.msra.mxu1 %v8746_v14  ;;  %8889 = vmatprep.mubr.f32.mxu1 %v9576_v0 }
 0x537   : > { %8899 = vmatprep.subr.mxu1 %v8661_v58 }
 0x53d   : > { %8892 = vmatmul.mubr.f32.vlgmr.msra.gmra.mrb[0].mxu1 %v8729_v3 }
 0x53e   : > { %8901 = vmatpush1.msra.mxu1 %v8663_v63  ;;  %8964 = vmatprep.mubr.f32.mxu1 %v9576_v0 }
 0x53f   : > { %8977 = vmatprep.subr.mxu1 %v8741_v1 }
 0x545   : > { %8968 = vmatmul.mubr.f32.vlgmr.msra.gmra.mrb[0].mxu1 %v8730_v5 }
 0x546   : > { %8981 = vmatpush1.msra.mxu1 %v8747_v6  ;;  %9044 = vmatprep.mubr.f32.mxu1 %v9576_v0 }
 0x547   : > { %9053 = vmatprep.subr.mxu1 %v8661_v58 }
 0x54d   : > { %9046 = vmatmul.mubr.f32.vlgmr.msra.gmra.mrb[0].mxu1 %v8728_v62 }
 0x54e   : > { %9055 = vmatpush1.msra.mxu1 %v8663_v63  ;;  %9118 = vmatprep.mubr.f32.mxu1 %v9576_v0 }
 0x555   : > { %9120 = vmatmul.mubr.f32.vlgmr.msra.gmra.mrb[0].mxu1 %v8728_v62 }
 0x628   : > { %v9121_v13 = vpop.f32.mrb[0].mxu1 }
 0x629   : > { %v9134_v15 = vadd.f32 %v9132_v10, %v9121_v13  ;;  %v9123_v16 = vpop.f32.mrb[1].mxu1 }
 0x62a   : > { %v9135_v46 = vadd.f32 %v9132_v10, %v9123_v16 }
 0x62c   : > { %v9139_v19 = vcombine.low %v9134_v15, %v9135_v46 }
 0x62e   : > { %v9141_v20 = vadd.f32 %v9139_v19, %v9136_v18 }
 0x630   : > { %9142 = vst [vmem:[%s217_s7] sm:$0xff] %v9141_v20 }
 0x631   : > { %9525 = shalt.err (!%p9522_p3)
}
 0x632   : > { %s9526_s11 = scalar_lea.hbm %s10166_s23, 128  ;;  %s9530_s16 = scalar_lea.hbm %s10213_s5, 256 }
 0x633   : > { %p9527_p4 = scmp.ne.s32.totalorder %s10166_s23, %s9526_s11  ;;  %p9531_p9 = scmp.lt.u32.totalorder %s10166_s23, %s10213_s5 }
 0x634   : > { %p9532_p10 = scmp.lt.u32.totalorder %s9530_s16, %s9526_s11  ;;  %p9534_p12 = scmp.lt.u32.totalorder %s9526_s11, %s10166_s23 }
 0x635   : > { %p9528_p7 = pnand %p9527_p4, %p9655_p5 }
 0x636   : > { %p9533_p11 = por %p9532_p10, %p9531_p9 }
 0x637   : > { %p9529_p8 = pneg %p9528_p7 }
 0x638   : > { %p9535_p13 = por %p9534_p12, %p9533_p11 }
 0x63a   : > { %p9536_p0 = pnand %p9535_p13, %p9529_p8 }
 0x63c   : > { %9539 = shalt.err (!%p9536_p0)
}
 0x63d   : > { %9459 = dma.vmem_to_hbm [thread:$0]  (%p9655_p5), %s10168_s8, 128, %s10166_s23, %s9144_s26  }
 0x63e PF: > { %p9465_p1 = scmp.ge.s32.totalorder %s9574_s21, 2  ;;  %s9170_s14 = sand.u32 1, %s9562_s18  }
 0x63f   : > { %s9171_s7 = scalar_lea.sflag [#allocation4], %s9170_s14 }
 0x640   : > { %p9462_p2 = pnand %p9465_p1, %p9659_p6 }
 0x642   : > { %9557 = dma.done.wait (!%p9462_p2), %s9171_s7, 128  }
 0x643   : > { %9559 = vsyncadd (!%p9462_p2), %s9171_s7, 4294967168  ;;  %p15_p3 = scmp.ge.s32.totalorder %s9642_s24, 4   ;;  %s10224_s18 = smov %s9566_s19 }
 0x644   : > { %s10225_s19 = smov %s9570_s20  ;;  %s10226_s20 = smov %s9653_s27 }
 0x645   : > { %s10227_s21 = smov %s9642_s24  ;;  %17 = sbr.rel (!%p15_p3) target bundleno = 3 (0x3), region = 91 }
 0x64c   :  { %9176 = vsyncpa [#allocation4], 1 }
 0x64d   :  { %9178 = vsyncpa [#allocation4 + $0x1], 1 }

</bundles_post_ra>
